<compile_context>
chip_gen: v7x
topology: tpu7x:2x2x1
jax: 0.10.0
libtpu: 0.0.40
codegen_flags: <defaults>
</compile_context>

<pallas_src>
import jax
import jax.numpy as jnp
import numpy as np
from jax import lax
from jax.experimental import pallas as pl
from jax.experimental.pallas import tpu as pltpu

# ----------------------------- model dims -----------------------------
VOCAB = 32
EMB_DIM = 16
HIDDEN = 32          # must be divisible by NUM_HEADS
NUM_HEADS = 4
HEAD_DIM = HIDDEN // NUM_HEADS
FC1_DIM = HIDDEN // 2
BATCH = 2
SEQ = 8


# ----------------------------- Pallas kernel -----------------------------
def feedback_kernel(
    emb_ref,    # (T*B, E)  time-major embedded tokens (row = t*B + b)
    wih_ref,    # (E, 4H)   LSTM input weights (transposed)
    whh_ref,    # (H, 4H)   LSTM recurrent weights (transposed)
    bl_ref,     # (1, 4H)   b_ih + b_hh
    wqkv_ref,   # (H, 3H)   fused [Wq^T | Wk^T | Wv^T]
    bqkv_ref,   # (1, 3H)   fused [bq | bk | bv]
    wo_ref,     # (H, H)    attention out_proj weight (transposed)
    bo_ref,     # (1, H)
    w1_ref,     # (H, H//2)
    b1_ref,     # (1, H//2)
    w2_ref,     # (H//2, 1)
    b2_ref,     # (1, 1)
    out_ref,    # (B, 1)
):
    f32 = jnp.float32
    H = whh_ref.shape[0]
    B = out_ref.shape[0]
    T = emb_ref.shape[0] // B

    # ---- LSTM (PyTorch gate order: i, f, g, o) ----
    # Hoisted input projection: one matmul for every timestep, off the serial chain.
    xw = jnp.dot(emb_ref[...], wih_ref[...], preferred_element_type=f32) + bl_ref[...]  # (T*B,4H)
    whh = whh_ref[...]

    h = jnp.zeros((B, H), f32)
    c = jnp.zeros((B, H), f32)
    hs = []
    for t in range(T):  # static unroll (T=8); one recurrent matmul per step
        gates = xw[t * B:(t + 1) * B, :] + jnp.dot(h, whh, preferred_element_type=f32)  # (B,4H)
        sig = lax.logistic(gates)        # full 4H width: single EUP pass
        tng = jnp.tanh(gates)            # full 4H width: single EUP pass
        i_g = sig[:, 0 * H:1 * H]
        f_g = sig[:, 1 * H:2 * H]
        g_g = tng[:, 2 * H:3 * H]
        o_g = sig[:, 3 * H:4 * H]
        c = f_g * c + i_g * g_g
        h = o_g * jnp.tanh(c)
        hs.append(h)

    seq2d = jnp.stack(hs, axis=1).reshape(B * T, H)              # (B*T, H) batch-major

    # ---- fused QKV projection (one matmul) ----
    qkv = jnp.dot(seq2d, wqkv_ref[...], preferred_element_type=f32) + bqkv_ref[...]  # (B*T,3H)
    scale = 1.0 / jnp.sqrt(jnp.float32(HEAD_DIM))
    q = (qkv[:, 0 * H:1 * H] * scale).reshape(B, T, H)           # scale q once
    k = qkv[:, 1 * H:2 * H].reshape(B, T, H)
    v = qkv[:, 2 * H:3 * H].reshape(B, T, H)

    # ---- multi-head attention, batched over B; mean-pool before out_proj ----
    pooled_heads = []
    for hd in range(NUM_HEADS):                                  # static loop of 4
        sl = slice(hd * HEAD_DIM, (hd + 1) * HEAD_DIM)
        qh, kh, vh = q[:, :, sl], k[:, :, sl], v[:, :, sl]       # (B,T,HD)
        scores = jnp.einsum('bqd,bkd->bqk', qh, kh,
                            preferred_element_type=f32)          # (B,T,T)
        probs = jax.nn.softmax(scores, axis=-1)
        ctx = jnp.einsum('bqk,bkd->bqd', probs, vh,
                         preferred_element_type=f32)             # (B,T,HD)
        pooled_heads.append(jnp.mean(ctx, axis=1))               # (B,HD) pooled over T
    pooled_ctx = jnp.concatenate(pooled_heads, axis=-1)          # (B,H)

    # out_proj applied to the pooled context (mean commutes with the linear layer)
    attn_pooled = (jnp.dot(pooled_ctx, wo_ref[...], preferred_element_type=f32)
                   + bo_ref[...])                                # (B,H)

    # ---- MLP head ----
    z1 = jax.nn.relu(jnp.dot(attn_pooled, w1_ref[...], preferred_element_type=f32)
                     + b1_ref[...])
    z2 = jnp.dot(z1, w2_ref[...], preferred_element_type=f32) + b2_ref[...]
    out_ref[...] = jax.nn.sigmoid(z2)


# ----------------------------- wrapper -----------------------------
@jax.jit
def feedback_forward(x_ids, params):
    # Embedding gather (dynamic HBM row gather) stays outside the kernel as glue.
    embedded = jnp.take(params["embedding"], x_ids, axis=0)      # (B, T, E)
    B, T = x_ids.shape
    E = embedded.shape[-1]
    H = HIDDEN
    emb_tm = jnp.transpose(embedded, (1, 0, 2)).reshape(T * B, E)  # time-major flat

    # pre-transpose / fuse weights for row-major matmuls in the kernel
    wih_t = params["w_ih"].T                                     # (E, 4H)
    whh_t = params["w_hh"].T                                     # (H, 4H)
    b_lstm = (params["b_ih"] + params["b_hh"]).reshape(1, 4 * H)

    wqkv_t = params["in_proj_w"].T                               # (H, 3H) = [Wq^T|Wk^T|Wv^T]
    bqkv = params["in_proj_b"].reshape(1, 3 * H)
    wo_t = params["out_proj_w"].T                                # (H, H)
    bo = params["out_proj_b"].reshape(1, H)

    w1_t = params["fc1_w"].T                                     # (H, H//2)
    b1 = params["fc1_b"].reshape(1, FC1_DIM)
    w2_t = params["fc2_w"].T                                     # (H//2, 1)
    b2 = params["fc2_b"].reshape(1, 1)

    vmem = pl.BlockSpec(memory_space=pltpu.MemorySpace.VMEM)
    # TODO(synk): if BATCH/SEQ grow, add a grid over batch with
    # dimension_semantics=("parallel",) so the second v7x TensorCore is used.
    return pl.pallas_call(
        feedback_kernel,
        out_shape=jax.ShapeDtypeStruct((B, 1), jnp.float32),
        in_specs=[vmem] * 12,
        out_specs=vmem,
    )(emb_tm, wih_t, whh_t, b_lstm, wqkv_t, bqkv, wo_t, bo, w1_t, b1, w2_t, b2)


# ----------------------------- pure-JAX reference -----------------------------
def feedback_reference(x_ids, params):
    emb = jnp.take(params["embedding"], x_ids, axis=0)           # (B, T, E)
    B, T, _ = emb.shape
    H = HIDDEN
    h = jnp.zeros((B, H), jnp.float32)
    c = jnp.zeros((B, H), jnp.float32)
    outs = []
    for t in range(T):
        gates = (emb[:, t] @ params["w_ih"].T + h @ params["w_hh"].T
                 + params["b_ih"] + params["b_hh"])
        i_g = jax.nn.sigmoid(gates[:, 0 * H:1 * H])
        f_g = jax.nn.sigmoid(gates[:, 1 * H:2 * H])
        g_g = jnp.tanh(gates[:, 2 * H:3 * H])
        o_g = jax.nn.sigmoid(gates[:, 3 * H:4 * H])
        c = f_g * c + i_g * g_g
        h = o_g * jnp.tanh(c)
        outs.append(h)
    seq = jnp.stack(outs, axis=1)                                # (B, T, H)

    wq = params["in_proj_w"][0 * H:1 * H]
    wk = params["in_proj_w"][1 * H:2 * H]
    wv = params["in_proj_w"][2 * H:3 * H]
    bq, bk, bv = jnp.split(params["in_proj_b"], 3)
    q = seq @ wq.T + bq
    k = seq @ wk.T + bk
    v = seq @ wv.T + bv

    def split_heads(x):
        return jnp.transpose(x.reshape(B, T, NUM_HEADS, HEAD_DIM), (0, 2, 1, 3))

    qh, kh, vh = split_heads(q), split_heads(k), split_heads(v)
    scores = jnp.einsum("bhqd,bhkd->bhqk", qh, kh) / jnp.sqrt(jnp.float32(HEAD_DIM))
    probs = jax.nn.softmax(scores, axis=-1)
    ctx = jnp.einsum("bhqk,bhkd->bhqd", probs, vh)
    ctx = jnp.transpose(ctx, (0, 2, 1, 3)).reshape(B, T, H)
    attn = ctx @ params["out_proj_w"].T + params["out_proj_b"]
    pooled = jnp.mean(attn, axis=1)
    z1 = jax.nn.relu(pooled @ params["fc1_w"].T + params["fc1_b"])
    return jax.nn.sigmoid(z1 @ params["fc2_w"].T + params["fc2_b"])


# ----------------------------- init + main -----------------------------
def init_params(key):
    ks = jax.random.split(key, 12)
    s = 0.1
    f32 = jnp.float32
    return {
        "embedding": jax.random.normal(ks[0], (VOCAB, EMB_DIM), f32) * s,
        "w_ih": jax.random.normal(ks[1], (4 * HIDDEN, EMB_DIM), f32) * s,
        "w_hh": jax.random.normal(ks[2], (4 * HIDDEN, HIDDEN), f32) * s,
        "b_ih": jax.random.normal(ks[3], (4 * HIDDEN,), f32) * s,
        "b_hh": jax.random.normal(ks[4], (4 * HIDDEN,), f32) * s,
        "in_proj_w": jax.random.normal(ks[5], (3 * HIDDEN, HIDDEN), f32) * s,
        "in_proj_b": jax.random.normal(ks[6], (3 * HIDDEN,), f32) * s,
        "out_proj_w": jax.random.normal(ks[7], (HIDDEN, HIDDEN), f32) * s,
        "out_proj_b": jax.random.normal(ks[8], (HIDDEN,), f32) * s,
        "fc1_w": jax.random.normal(ks[9], (FC1_DIM, HIDDEN), f32) * s,
        "fc1_b": jnp.zeros((FC1_DIM,), f32),
        "fc2_w": jax.random.normal(ks[10], (1, FC1_DIM), f32) * s,
        "fc2_b": jnp.zeros((1,), f32),
    }


if __name__ == "__main__":
    key = jax.random.PRNGKey(0)
    k_x, k_p = jax.random.split(key)
    x_ids = jax.random.randint(k_x, (BATCH, SEQ), 0, VOCAB, dtype=jnp.int32)
    params = init_params(k_p)

    out = jax.block_until_ready(feedback_forward(x_ids, params))

    ref = feedback_reference(x_ids, params)
    np.testing.assert_allclose(np.asarray(out), np.asarray(ref), rtol=1e-4, atol=1e-5)

    assert out.shape == (BATCH, 1)
    print("KERNEL_OK")
</pallas_src>

<mosaic_0001>
module attributes {stable_mosaic.version = 11 : i64} {
  func.func @feedback_kernel(%arg0: memref<16x16xf32, #tpu.memory_space<vmem>>, %arg1: memref<16x128xf32, #tpu.memory_space<vmem>>, %arg2: memref<32x128xf32, #tpu.memory_space<vmem>>, %arg3: memref<1x128xf32, #tpu.memory_space<vmem>>, %arg4: memref<32x96xf32, #tpu.memory_space<vmem>>, %arg5: memref<1x96xf32, #tpu.memory_space<vmem>>, %arg6: memref<32x32xf32, #tpu.memory_space<vmem>>, %arg7: memref<1x32xf32, #tpu.memory_space<vmem>>, %arg8: memref<32x16xf32, #tpu.memory_space<vmem>>, %arg9: memref<1x16xf32, #tpu.memory_space<vmem>>, %arg10: memref<16x1xf32, #tpu.memory_space<vmem>>, %arg11: memref<1x1xf32, #tpu.memory_space<vmem>>, %arg12: memref<2x1xf32, #tpu.memory_space<vmem>>) attributes {dimension_semantics = [], scalar_prefetch = 0 : i64, scratch_operands = 0 : i64, tpu.core_type = #tpu.core_type<tc>} {
    %c0 = arith.constant 0 : index
    %c0_0 = arith.constant 0 : index
    %0 = vector.load %arg0[%c0, %c0_0] : memref<16x16xf32, #tpu.memory_space<vmem>>, vector<16x16xf32>
    %c0_1 = arith.constant 0 : index
    %c0_2 = arith.constant 0 : index
    %1 = vector.load %arg1[%c0_1, %c0_2] : memref<16x128xf32, #tpu.memory_space<vmem>>, vector<16x128xf32>
    %cst = arith.constant dense<0.000000e+00> : vector<16x128xf32>
    %2 = tpu.matmul %0, %1, %cst {dimension_numbers = #tpu.dot_dimension_numbers<[1], [0], [0], [1], [0, 0, 1, 1], [], []>} : vector<16x16xf32>, vector<16x128xf32>, vector<16x128xf32> -> vector<16x128xf32>
    %c0_3 = arith.constant 0 : index
    %c0_4 = arith.constant 0 : index
    %3 = vector.load %arg3[%c0_3, %c0_4] : memref<1x128xf32, #tpu.memory_space<vmem>>, vector<1x128xf32>
    %4 = vector.broadcast %3 : vector<1x128xf32> to vector<16x128xf32>
    %5 = arith.addf %2, %4 : vector<16x128xf32>
    %c0_5 = arith.constant 0 : index
    %c0_6 = arith.constant 0 : index
    %6 = vector.load %arg2[%c0_5, %c0_6] : memref<32x128xf32, #tpu.memory_space<vmem>>, vector<32x128xf32>
    %cst_7 = arith.constant 0.000000e+00 : f32
    %7 = vector.broadcast %cst_7 : f32 to vector<2x32xf32>
    %cst_8 = arith.constant 0.000000e+00 : f32
    %8 = vector.broadcast %cst_8 : f32 to vector<2x32xf32>
    %9 = vector.extract_strided_slice %5 {offsets = [0, 0], sizes = [2, 128], strides = [1, 1]} : vector<16x128xf32> to vector<2x128xf32>
    %cst_9 = arith.constant dense<0.000000e+00> : vector<2x128xf32>
    %10 = tpu.matmul %7, %6, %cst_9 {dimension_numbers = #tpu.dot_dimension_numbers<[1], [0], [0], [1], [0, 0, 1, 1], [], []>} : vector<2x32xf32>, vector<32x128xf32>, vector<2x128xf32> -> vector<2x128xf32>
    %11 = arith.addf %9, %10 : vector<2x128xf32>
    %12 = arith.negf %11 : vector<2x128xf32>
    %13 = math.exp %12 : vector<2x128xf32>
    %cst_10 = arith.constant 1.000000e+00 : f32
    %14 = vector.broadcast %cst_10 : f32 to vector<2x128xf32>
    %15 = arith.addf %14, %13 : vector<2x128xf32>
    %16 = arith.divf %14, %15 : vector<2x128xf32>
    %17 = math.tanh %11 : vector<2x128xf32>
    %18 = vector.extract_strided_slice %16 {offsets = [0, 0], sizes = [2, 32], strides = [1, 1]} : vector<2x128xf32> to vector<2x32xf32>
    %19 = vector.extract_strided_slice %16 {offsets = [0, 32], sizes = [2, 32], strides = [1, 1]} : vector<2x128xf32> to vector<2x32xf32>
    %20 = vector.extract_strided_slice %17 {offsets = [0, 64], sizes = [2, 32], strides = [1, 1]} : vector<2x128xf32> to vector<2x32xf32>
    %21 = vector.extract_strided_slice %16 {offsets = [0, 96], sizes = [2, 32], strides = [1, 1]} : vector<2x128xf32> to vector<2x32xf32>
    %22 = arith.mulf %19, %8 : vector<2x32xf32>
    %23 = arith.mulf %18, %20 : vector<2x32xf32>
    %24 = arith.addf %22, %23 : vector<2x32xf32>
    %25 = math.tanh %24 : vector<2x32xf32>
    %26 = arith.mulf %21, %25 : vector<2x32xf32>
    %27 = vector.extract_strided_slice %5 {offsets = [2, 0], sizes = [2, 128], strides = [1, 1]} : vector<16x128xf32> to vector<2x128xf32>
    %cst_11 = arith.constant dense<0.000000e+00> : vector<2x128xf32>
    %28 = tpu.matmul %26, %6, %cst_11 {dimension_numbers = #tpu.dot_dimension_numbers<[1], [0], [0], [1], [0, 0, 1, 1], [], []>} : vector<2x32xf32>, vector<32x128xf32>, vector<2x128xf32> -> vector<2x128xf32>
    %29 = arith.addf %27, %28 : vector<2x128xf32>
    %30 = arith.negf %29 : vector<2x128xf32>
    %31 = math.exp %30 : vector<2x128xf32>
    %cst_12 = arith.constant 1.000000e+00 : f32
    %32 = vector.broadcast %cst_12 : f32 to vector<2x128xf32>
    %33 = arith.addf %32, %31 : vector<2x128xf32>
    %34 = arith.divf %32, %33 : vector<2x128xf32>
    %35 = math.tanh %29 : vector<2x128xf32>
    %36 = vector.extract_strided_slice %34 {offsets = [0, 0], sizes = [2, 32], strides = [1, 1]} : vector<2x128xf32> to vector<2x32xf32>
    %37 = vector.extract_strided_slice %34 {offsets = [0, 32], sizes = [2, 32], strides = [1, 1]} : vector<2x128xf32> to vector<2x32xf32>
    %38 = vector.extract_strided_slice %35 {offsets = [0, 64], sizes = [2, 32], strides = [1, 1]} : vector<2x128xf32> to vector<2x32xf32>
    %39 = vector.extract_strided_slice %34 {offsets = [0, 96], sizes = [2, 32], strides = [1, 1]} : vector<2x128xf32> to vector<2x32xf32>
    %40 = arith.mulf %37, %24 : vector<2x32xf32>
    %41 = arith.mulf %36, %38 : vector<2x32xf32>
    %42 = arith.addf %40, %41 : vector<2x32xf32>
    %43 = math.tanh %42 : vector<2x32xf32>
    %44 = arith.mulf %39, %43 : vector<2x32xf32>
    %45 = vector.extract_strided_slice %5 {offsets = [4, 0], sizes = [2, 128], strides = [1, 1]} : vector<16x128xf32> to vector<2x128xf32>
    %cst_13 = arith.constant dense<0.000000e+00> : vector<2x128xf32>
    %46 = tpu.matmul %44, %6, %cst_13 {dimension_numbers = #tpu.dot_dimension_numbers<[1], [0], [0], [1], [0, 0, 1, 1], [], []>} : vector<2x32xf32>, vector<32x128xf32>, vector<2x128xf32> -> vector<2x128xf32>
    %47 = arith.addf %45, %46 : vector<2x128xf32>
    %48 = arith.negf %47 : vector<2x128xf32>
    %49 = math.exp %48 : vector<2x128xf32>
    %cst_14 = arith.constant 1.000000e+00 : f32
    %50 = vector.broadcast %cst_14 : f32 to vector<2x128xf32>
    %51 = arith.addf %50, %49 : vector<2x128xf32>
    %52 = arith.divf %50, %51 : vector<2x128xf32>
    %53 = math.tanh %47 : vector<2x128xf32>
    %54 = vector.extract_strided_slice %52 {offsets = [0, 0], sizes = [2, 32], strides = [1, 1]} : vector<2x128xf32> to vector<2x32xf32>
    %55 = vector.extract_strided_slice %52 {offsets = [0, 32], sizes = [2, 32], strides = [1, 1]} : vector<2x128xf32> to vector<2x32xf32>
    %56 = vector.extract_strided_slice %53 {offsets = [0, 64], sizes = [2, 32], strides = [1, 1]} : vector<2x128xf32> to vector<2x32xf32>
    %57 = vector.extract_strided_slice %52 {offsets = [0, 96], sizes = [2, 32], strides = [1, 1]} : vector<2x128xf32> to vector<2x32xf32>
    %58 = arith.mulf %55, %42 : vector<2x32xf32>
    %59 = arith.mulf %54, %56 : vector<2x32xf32>
    %60 = arith.addf %58, %59 : vector<2x32xf32>
    %61 = math.tanh %60 : vector<2x32xf32>
    %62 = arith.mulf %57, %61 : vector<2x32xf32>
    %63 = vector.extract_strided_slice %5 {offsets = [6, 0], sizes = [2, 128], strides = [1, 1]} : vector<16x128xf32> to vector<2x128xf32>
    %cst_15 = arith.constant dense<0.000000e+00> : vector<2x128xf32>
    %64 = tpu.matmul %62, %6, %cst_15 {dimension_numbers = #tpu.dot_dimension_numbers<[1], [0], [0], [1], [0, 0, 1, 1], [], []>} : vector<2x32xf32>, vector<32x128xf32>, vector<2x128xf32> -> vector<2x128xf32>
    %65 = arith.addf %63, %64 : vector<2x128xf32>
    %66 = arith.negf %65 : vector<2x128xf32>
    %67 = math.exp %66 : vector<2x128xf32>
    %cst_16 = arith.constant 1.000000e+00 : f32
    %68 = vector.broadcast %cst_16 : f32 to vector<2x128xf32>
    %69 = arith.addf %68, %67 : vector<2x128xf32>
    %70 = arith.divf %68, %69 : vector<2x128xf32>
    %71 = math.tanh %65 : vector<2x128xf32>
    %72 = vector.extract_strided_slice %70 {offsets = [0, 0], sizes = [2, 32], strides = [1, 1]} : vector<2x128xf32> to vector<2x32xf32>
    %73 = vector.extract_strided_slice %70 {offsets = [0, 32], sizes = [2, 32], strides = [1, 1]} : vector<2x128xf32> to vector<2x32xf32>
    %74 = vector.extract_strided_slice %71 {offsets = [0, 64], sizes = [2, 32], strides = [1, 1]} : vector<2x128xf32> to vector<2x32xf32>
    %75 = vector.extract_strided_slice %70 {offsets = [0, 96], sizes = [2, 32], strides = [1, 1]} : vector<2x128xf32> to vector<2x32xf32>
    %76 = arith.mulf %73, %60 : vector<2x32xf32>
    %77 = arith.mulf %72, %74 : vector<2x32xf32>
    %78 = arith.addf %76, %77 : vector<2x32xf32>
    %79 = math.tanh %78 : vector<2x32xf32>
    %80 = arith.mulf %75, %79 : vector<2x32xf32>
    %81 = vector.extract_strided_slice %5 {offsets = [8, 0], sizes = [2, 128], strides = [1, 1]} : vector<16x128xf32> to vector<2x128xf32>
    %cst_17 = arith.constant dense<0.000000e+00> : vector<2x128xf32>
    %82 = tpu.matmul %80, %6, %cst_17 {dimension_numbers = #tpu.dot_dimension_numbers<[1], [0], [0], [1], [0, 0, 1, 1], [], []>} : vector<2x32xf32>, vector<32x128xf32>, vector<2x128xf32> -> vector<2x128xf32>
    %83 = arith.addf %81, %82 : vector<2x128xf32>
    %84 = arith.negf %83 : vector<2x128xf32>
    %85 = math.exp %84 : vector<2x128xf32>
    %cst_18 = arith.constant 1.000000e+00 : f32
    %86 = vector.broadcast %cst_18 : f32 to vector<2x128xf32>
    %87 = arith.addf %86, %85 : vector<2x128xf32>
    %88 = arith.divf %86, %87 : vector<2x128xf32>
    %89 = math.tanh %83 : vector<2x128xf32>
    %90 = vector.extract_strided_slice %88 {offsets = [0, 0], sizes = [2, 32], strides = [1, 1]} : vector<2x128xf32> to vector<2x32xf32>
    %91 = vector.extract_strided_slice %88 {offsets = [0, 32], sizes = [2, 32], strides = [1, 1]} : vector<2x128xf32> to vector<2x32xf32>
    %92 = vector.extract_strided_slice %89 {offsets = [0, 64], sizes = [2, 32], strides = [1, 1]} : vector<2x128xf32> to vector<2x32xf32>
    %93 = vector.extract_strided_slice %88 {offsets = [0, 96], sizes = [2, 32], strides = [1, 1]} : vector<2x128xf32> to vector<2x32xf32>
    %94 = arith.mulf %91, %78 : vector<2x32xf32>
    %95 = arith.mulf %90, %92 : vector<2x32xf32>
    %96 = arith.addf %94, %95 : vector<2x32xf32>
    %97 = math.tanh %96 : vector<2x32xf32>
    %98 = arith.mulf %93, %97 : vector<2x32xf32>
    %99 = vector.extract_strided_slice %5 {offsets = [10, 0], sizes = [2, 128], strides = [1, 1]} : vector<16x128xf32> to vector<2x128xf32>
    %cst_19 = arith.constant dense<0.000000e+00> : vector<2x128xf32>
    %100 = tpu.matmul %98, %6, %cst_19 {dimension_numbers = #tpu.dot_dimension_numbers<[1], [0], [0], [1], [0, 0, 1, 1], [], []>} : vector<2x32xf32>, vector<32x128xf32>, vector<2x128xf32> -> vector<2x128xf32>
    %101 = arith.addf %99, %100 : vector<2x128xf32>
    %102 = arith.negf %101 : vector<2x128xf32>
    %103 = math.exp %102 : vector<2x128xf32>
    %cst_20 = arith.constant 1.000000e+00 : f32
    %104 = vector.broadcast %cst_20 : f32 to vector<2x128xf32>
    %105 = arith.addf %104, %103 : vector<2x128xf32>
    %106 = arith.divf %104, %105 : vector<2x128xf32>
    %107 = math.tanh %101 : vector<2x128xf32>
    %108 = vector.extract_strided_slice %106 {offsets = [0, 0], sizes = [2, 32], strides = [1, 1]} : vector<2x128xf32> to vector<2x32xf32>
    %109 = vector.extract_strided_slice %106 {offsets = [0, 32], sizes = [2, 32], strides = [1, 1]} : vector<2x128xf32> to vector<2x32xf32>
    %110 = vector.extract_strided_slice %107 {offsets = [0, 64], sizes = [2, 32], strides = [1, 1]} : vector<2x128xf32> to vector<2x32xf32>
    %111 = vector.extract_strided_slice %106 {offsets = [0, 96], sizes = [2, 32], strides = [1, 1]} : vector<2x128xf32> to vector<2x32xf32>
    %112 = arith.mulf %109, %96 : vector<2x32xf32>
    %113 = arith.mulf %108, %110 : vector<2x32xf32>
    %114 = arith.addf %112, %113 : vector<2x32xf32>
    %115 = math.tanh %114 : vector<2x32xf32>
    %116 = arith.mulf %111, %115 : vector<2x32xf32>
    %117 = vector.extract_strided_slice %5 {offsets = [12, 0], sizes = [2, 128], strides = [1, 1]} : vector<16x128xf32> to vector<2x128xf32>
    %cst_21 = arith.constant dense<0.000000e+00> : vector<2x128xf32>
    %118 = tpu.matmul %116, %6, %cst_21 {dimension_numbers = #tpu.dot_dimension_numbers<[1], [0], [0], [1], [0, 0, 1, 1], [], []>} : vector<2x32xf32>, vector<32x128xf32>, vector<2x128xf32> -> vector<2x128xf32>
    %119 = arith.addf %117, %118 : vector<2x128xf32>
    %120 = arith.negf %119 : vector<2x128xf32>
    %121 = math.exp %120 : vector<2x128xf32>
    %cst_22 = arith.constant 1.000000e+00 : f32
    %122 = vector.broadcast %cst_22 : f32 to vector<2x128xf32>
    %123 = arith.addf %122, %121 : vector<2x128xf32>
    %124 = arith.divf %122, %123 : vector<2x128xf32>
    %125 = math.tanh %119 : vector<2x128xf32>
    %126 = vector.extract_strided_slice %124 {offsets = [0, 0], sizes = [2, 32], strides = [1, 1]} : vector<2x128xf32> to vector<2x32xf32>
    %127 = vector.extract_strided_slice %124 {offsets = [0, 32], sizes = [2, 32], strides = [1, 1]} : vector<2x128xf32> to vector<2x32xf32>
    %128 = vector.extract_strided_slice %125 {offsets = [0, 64], sizes = [2, 32], strides = [1, 1]} : vector<2x128xf32> to vector<2x32xf32>
    %129 = vector.extract_strided_slice %124 {offsets = [0, 96], sizes = [2, 32], strides = [1, 1]} : vector<2x128xf32> to vector<2x32xf32>
    %130 = arith.mulf %127, %114 : vector<2x32xf32>
    %131 = arith.mulf %126, %128 : vector<2x32xf32>
    %132 = arith.addf %130, %131 : vector<2x32xf32>
    %133 = math.tanh %132 : vector<2x32xf32>
    %134 = arith.mulf %129, %133 : vector<2x32xf32>
    %135 = vector.extract_strided_slice %5 {offsets = [14, 0], sizes = [2, 128], strides = [1, 1]} : vector<16x128xf32> to vector<2x128xf32>
    %cst_23 = arith.constant dense<0.000000e+00> : vector<2x128xf32>
    %136 = tpu.matmul %134, %6, %cst_23 {dimension_numbers = #tpu.dot_dimension_numbers<[1], [0], [0], [1], [0, 0, 1, 1], [], []>} : vector<2x32xf32>, vector<32x128xf32>, vector<2x128xf32> -> vector<2x128xf32>
    %137 = arith.addf %135, %136 : vector<2x128xf32>
    %138 = arith.negf %137 : vector<2x128xf32>
    %139 = math.exp %138 : vector<2x128xf32>
    %cst_24 = arith.constant 1.000000e+00 : f32
    %140 = vector.broadcast %cst_24 : f32 to vector<2x128xf32>
    %141 = arith.addf %140, %139 : vector<2x128xf32>
    %142 = arith.divf %140, %141 : vector<2x128xf32>
    %143 = math.tanh %137 : vector<2x128xf32>
    %144 = vector.extract_strided_slice %142 {offsets = [0, 0], sizes = [2, 32], strides = [1, 1]} : vector<2x128xf32> to vector<2x32xf32>
    %145 = vector.extract_strided_slice %142 {offsets = [0, 32], sizes = [2, 32], strides = [1, 1]} : vector<2x128xf32> to vector<2x32xf32>
    %146 = vector.extract_strided_slice %143 {offsets = [0, 64], sizes = [2, 32], strides = [1, 1]} : vector<2x128xf32> to vector<2x32xf32>
    %147 = vector.extract_strided_slice %142 {offsets = [0, 96], sizes = [2, 32], strides = [1, 1]} : vector<2x128xf32> to vector<2x32xf32>
    %148 = arith.mulf %145, %132 : vector<2x32xf32>
    %149 = arith.mulf %144, %146 : vector<2x32xf32>
    %150 = arith.addf %148, %149 : vector<2x32xf32>
    %151 = math.tanh %150 : vector<2x32xf32>
    %152 = arith.mulf %147, %151 : vector<2x32xf32>
    %153 = vector.shape_cast %26 : vector<2x32xf32> to vector<2x1x32xf32>
    %154 = vector.shape_cast %44 : vector<2x32xf32> to vector<2x1x32xf32>
    %155 = vector.shape_cast %62 : vector<2x32xf32> to vector<2x1x32xf32>
    %156 = vector.shape_cast %80 : vector<2x32xf32> to vector<2x1x32xf32>
    %157 = vector.shape_cast %98 : vector<2x32xf32> to vector<2x1x32xf32>
    %158 = vector.shape_cast %116 : vector<2x32xf32> to vector<2x1x32xf32>
    %159 = vector.shape_cast %134 : vector<2x32xf32> to vector<2x1x32xf32>
    %160 = vector.shape_cast %152 : vector<2x32xf32> to vector<2x1x32xf32>
    %161 = tpu.concatenate %153, %154, %155, %156, %157, %158, %159, %160 in 1 : vector<2x1x32xf32>, vector<2x1x32xf32>, vector<2x1x32xf32>, vector<2x1x32xf32>, vector<2x1x32xf32>, vector<2x1x32xf32>, vector<2x1x32xf32>, vector<2x1x32xf32> -> vector<2x8x32xf32>
    %162 = vector.shape_cast %161 : vector<2x8x32xf32> to vector<16x32xf32>
    %c0_25 = arith.constant 0 : index
    %c0_26 = arith.constant 0 : index
    %163 = vector.load %arg4[%c0_25, %c0_26] : memref<32x96xf32, #tpu.memory_space<vmem>>, vector<32x96xf32>
    %cst_27 = arith.constant dense<0.000000e+00> : vector<16x96xf32>
    %164 = tpu.matmul %162, %163, %cst_27 {dimension_numbers = #tpu.dot_dimension_numbers<[1], [0], [0], [1], [0, 0, 1, 1], [], []>} : vector<16x32xf32>, vector<32x96xf32>, vector<16x96xf32> -> vector<16x96xf32>
    %c0_28 = arith.constant 0 : index
    %c0_29 = arith.constant 0 : index
    %165 = vector.load %arg5[%c0_28, %c0_29] : memref<1x96xf32, #tpu.memory_space<vmem>>, vector<1x96xf32>
    %166 = vector.broadcast %165 : vector<1x96xf32> to vector<16x96xf32>
    %167 = arith.addf %164, %166 : vector<16x96xf32>
    %cst_30 = arith.constant 8.000000e+00 : f32
    %168 = math.sqrt %cst_30 : f32
    %cst_31 = arith.constant 1.000000e+00 : f32
    %169 = arith.divf %cst_31, %168 : f32
    %170 = vector.extract_strided_slice %167 {offsets = [0, 0], sizes = [16, 32], strides = [1, 1]} : vector<16x96xf32> to vector<16x32xf32>
    %171 = vector.broadcast %169 : f32 to vector<16x32xf32>
    %172 = arith.mulf %170, %171 : vector<16x32xf32>
    %173 = vector.shape_cast %172 : vector<16x32xf32> to vector<2x8x32xf32>
    %174 = vector.extract_strided_slice %167 {offsets = [0, 32], sizes = [16, 32], strides = [1, 1]} : vector<16x96xf32> to vector<16x32xf32>
    %175 = vector.shape_cast %174 : vector<16x32xf32> to vector<2x8x32xf32>
    %176 = vector.extract_strided_slice %167 {offsets = [0, 64], sizes = [16, 32], strides = [1, 1]} : vector<16x96xf32> to vector<16x32xf32>
    %177 = vector.shape_cast %176 : vector<16x32xf32> to vector<2x8x32xf32>
    %178 = vector.extract_strided_slice %173 {offsets = [0, 0, 0], sizes = [2, 8, 8], strides = [1, 1, 1]} : vector<2x8x32xf32> to vector<2x8x8xf32>
    %179 = vector.extract_strided_slice %175 {offsets = [0, 0, 0], sizes = [2, 8, 8], strides = [1, 1, 1]} : vector<2x8x32xf32> to vector<2x8x8xf32>
    %180 = vector.extract_strided_slice %177 {offsets = [0, 0, 0], sizes = [2, 8, 8], strides = [1, 1, 1]} : vector<2x8x32xf32> to vector<2x8x8xf32>
    "tpu.trace_start"() <{level = 10 : i32, message = "bqd,bkd->bqk"}> : () -> ()
    %cst_32 = arith.constant dense<0.000000e+00> : vector<2x8x8xf32>
    %181 = tpu.matmul %178, %179, %cst_32 {dimension_numbers = #tpu.dot_dimension_numbers<[2], [2], [1], [1], [0, 0, 0, 1, 1, 1], [0], [0]>} : vector<2x8x8xf32>, vector<2x8x8xf32>, vector<2x8x8xf32> -> vector<2x8x8xf32>
    "tpu.trace_stop"() : () -> ()
    %cst_33 = arith.constant dense<0xFF800000> : vector<2x8xf32>
    %182 = vector.multi_reduction <maximumf>, %181, %cst_33 [2] : vector<2x8x8xf32> to vector<2x8xf32>
    %cst_34 = arith.constant 0xFF800000 : f32
    %183 = vector.broadcast %cst_34 : f32 to vector<2x8xf32>
    %184 = arith.maximumf %183, %182 : vector<2x8xf32>
    %185 = vector.shape_cast %184 : vector<2x8xf32> to vector<2x8x1xf32>
    %186 = vector.broadcast %185 : vector<2x8x1xf32> to vector<2x8x8xf32>
    %187 = arith.subf %181, %186 : vector<2x8x8xf32>
    %188 = math.exp %187 : vector<2x8x8xf32>
    %cst_35 = arith.constant dense<0.000000e+00> : vector<2x8xf32>
    %189 = vector.multi_reduction <add>, %188, %cst_35 [2] : vector<2x8x8xf32> to vector<2x8xf32>
    %190 = vector.shape_cast %189 : vector<2x8xf32> to vector<2x8x1xf32>
    %191 = vector.broadcast %190 : vector<2x8x1xf32> to vector<2x8x8xf32>
    %192 = arith.divf %188, %191 : vector<2x8x8xf32>
    "tpu.trace_start"() <{level = 10 : i32, message = "bqk,bkd->bqd"}> : () -> ()
    %cst_36 = arith.constant dense<0.000000e+00> : vector<2x8x8xf32>
    %193 = tpu.matmul %192, %180, %cst_36 {dimension_numbers = #tpu.dot_dimension_numbers<[2], [1], [1], [2], [0, 0, 0, 1, 1, 2], [0], [0]>} : vector<2x8x8xf32>, vector<2x8x8xf32>, vector<2x8x8xf32> -> vector<2x8x8xf32>
    "tpu.trace_stop"() : () -> ()
    %cst_37 = arith.constant dense<0.000000e+00> : vector<2x8xf32>
    %194 = vector.multi_reduction <add>, %193, %cst_37 [1] : vector<2x8x8xf32> to vector<2x8xf32>
    %cst_38 = arith.constant 8.000000e+00 : f32
    %195 = vector.broadcast %cst_38 : f32 to vector<2x8xf32>
    %196 = arith.divf %194, %195 : vector<2x8xf32>
    %197 = vector.extract_strided_slice %173 {offsets = [0, 0, 8], sizes = [2, 8, 8], strides = [1, 1, 1]} : vector<2x8x32xf32> to vector<2x8x8xf32>
    %198 = vector.extract_strided_slice %175 {offsets = [0, 0, 8], sizes = [2, 8, 8], strides = [1, 1, 1]} : vector<2x8x32xf32> to vector<2x8x8xf32>
    %199 = vector.extract_strided_slice %177 {offsets = [0, 0, 8], sizes = [2, 8, 8], strides = [1, 1, 1]} : vector<2x8x32xf32> to vector<2x8x8xf32>
    "tpu.trace_start"() <{level = 10 : i32, message = "bqd,bkd->bqk"}> : () -> ()
    %cst_39 = arith.constant dense<0.000000e+00> : vector<2x8x8xf32>
    %200 = tpu.matmul %197, %198, %cst_39 {dimension_numbers = #tpu.dot_dimension_numbers<[2], [2], [1], [1], [0, 0, 0, 1, 1, 1], [0], [0]>} : vector<2x8x8xf32>, vector<2x8x8xf32>, vector<2x8x8xf32> -> vector<2x8x8xf32>
    "tpu.trace_stop"() : () -> ()
    %cst_40 = arith.constant dense<0xFF800000> : vector<2x8xf32>
    %201 = vector.multi_reduction <maximumf>, %200, %cst_40 [2] : vector<2x8x8xf32> to vector<2x8xf32>
    %cst_41 = arith.constant 0xFF800000 : f32
    %202 = vector.broadcast %cst_41 : f32 to vector<2x8xf32>
    %203 = arith.maximumf %202, %201 : vector<2x8xf32>
    %204 = vector.shape_cast %203 : vector<2x8xf32> to vector<2x8x1xf32>
    %205 = vector.broadcast %204 : vector<2x8x1xf32> to vector<2x8x8xf32>
    %206 = arith.subf %200, %205 : vector<2x8x8xf32>
    %207 = math.exp %206 : vector<2x8x8xf32>
    %cst_42 = arith.constant dense<0.000000e+00> : vector<2x8xf32>
    %208 = vector.multi_reduction <add>, %207, %cst_42 [2] : vector<2x8x8xf32> to vector<2x8xf32>
    %209 = vector.shape_cast %208 : vector<2x8xf32> to vector<2x8x1xf32>
    %210 = vector.broadcast %209 : vector<2x8x1xf32> to vector<2x8x8xf32>
    %211 = arith.divf %207, %210 : vector<2x8x8xf32>
    "tpu.trace_start"() <{level = 10 : i32, message = "bqk,bkd->bqd"}> : () -> ()
    %cst_43 = arith.constant dense<0.000000e+00> : vector<2x8x8xf32>
    %212 = tpu.matmul %211, %199, %cst_43 {dimension_numbers = #tpu.dot_dimension_numbers<[2], [1], [1], [2], [0, 0, 0, 1, 1, 2], [0], [0]>} : vector<2x8x8xf32>, vector<2x8x8xf32>, vector<2x8x8xf32> -> vector<2x8x8xf32>
    "tpu.trace_stop"() : () -> ()
    %cst_44 = arith.constant dense<0.000000e+00> : vector<2x8xf32>
    %213 = vector.multi_reduction <add>, %212, %cst_44 [1] : vector<2x8x8xf32> to vector<2x8xf32>
    %cst_45 = arith.constant 8.000000e+00 : f32
    %214 = vector.broadcast %cst_45 : f32 to vector<2x8xf32>
    %215 = arith.divf %213, %214 : vector<2x8xf32>
    %216 = vector.extract_strided_slice %173 {offsets = [0, 0, 16], sizes = [2, 8, 8], strides = [1, 1, 1]} : vector<2x8x32xf32> to vector<2x8x8xf32>
    %217 = vector.extract_strided_slice %175 {offsets = [0, 0, 16], sizes = [2, 8, 8], strides = [1, 1, 1]} : vector<2x8x32xf32> to vector<2x8x8xf32>
    %218 = vector.extract_strided_slice %177 {offsets = [0, 0, 16], sizes = [2, 8, 8], strides = [1, 1, 1]} : vector<2x8x32xf32> to vector<2x8x8xf32>
    "tpu.trace_start"() <{level = 10 : i32, message = "bqd,bkd->bqk"}> : () -> ()
    %cst_46 = arith.constant dense<0.000000e+00> : vector<2x8x8xf32>
    %219 = tpu.matmul %216, %217, %cst_46 {dimension_numbers = #tpu.dot_dimension_numbers<[2], [2], [1], [1], [0, 0, 0, 1, 1, 1], [0], [0]>} : vector<2x8x8xf32>, vector<2x8x8xf32>, vector<2x8x8xf32> -> vector<2x8x8xf32>
    "tpu.trace_stop"() : () -> ()
    %cst_47 = arith.constant dense<0xFF800000> : vector<2x8xf32>
    %220 = vector.multi_reduction <maximumf>, %219, %cst_47 [2] : vector<2x8x8xf32> to vector<2x8xf32>
    %cst_48 = arith.constant 0xFF800000 : f32
    %221 = vector.broadcast %cst_48 : f32 to vector<2x8xf32>
    %222 = arith.maximumf %221, %220 : vector<2x8xf32>
    %223 = vector.shape_cast %222 : vector<2x8xf32> to vector<2x8x1xf32>
    %224 = vector.broadcast %223 : vector<2x8x1xf32> to vector<2x8x8xf32>
    %225 = arith.subf %219, %224 : vector<2x8x8xf32>
    %226 = math.exp %225 : vector<2x8x8xf32>
    %cst_49 = arith.constant dense<0.000000e+00> : vector<2x8xf32>
    %227 = vector.multi_reduction <add>, %226, %cst_49 [2] : vector<2x8x8xf32> to vector<2x8xf32>
    %228 = vector.shape_cast %227 : vector<2x8xf32> to vector<2x8x1xf32>
    %229 = vector.broadcast %228 : vector<2x8x1xf32> to vector<2x8x8xf32>
    %230 = arith.divf %226, %229 : vector<2x8x8xf32>
    "tpu.trace_start"() <{level = 10 : i32, message = "bqk,bkd->bqd"}> : () -> ()
    %cst_50 = arith.constant dense<0.000000e+00> : vector<2x8x8xf32>
    %231 = tpu.matmul %230, %218, %cst_50 {dimension_numbers = #tpu.dot_dimension_numbers<[2], [1], [1], [2], [0, 0, 0, 1, 1, 2], [0], [0]>} : vector<2x8x8xf32>, vector<2x8x8xf32>, vector<2x8x8xf32> -> vector<2x8x8xf32>
    "tpu.trace_stop"() : () -> ()
    %cst_51 = arith.constant dense<0.000000e+00> : vector<2x8xf32>
    %232 = vector.multi_reduction <add>, %231, %cst_51 [1] : vector<2x8x8xf32> to vector<2x8xf32>
    %cst_52 = arith.constant 8.000000e+00 : f32
    %233 = vector.broadcast %cst_52 : f32 to vector<2x8xf32>
    %234 = arith.divf %232, %233 : vector<2x8xf32>
    %235 = vector.extract_strided_slice %173 {offsets = [0, 0, 24], sizes = [2, 8, 8], strides = [1, 1, 1]} : vector<2x8x32xf32> to vector<2x8x8xf32>
    %236 = vector.extract_strided_slice %175 {offsets = [0, 0, 24], sizes = [2, 8, 8], strides = [1, 1, 1]} : vector<2x8x32xf32> to vector<2x8x8xf32>
    %237 = vector.extract_strided_slice %177 {offsets = [0, 0, 24], sizes = [2, 8, 8], strides = [1, 1, 1]} : vector<2x8x32xf32> to vector<2x8x8xf32>
    "tpu.trace_start"() <{level = 10 : i32, message = "bqd,bkd->bqk"}> : () -> ()
    %cst_53 = arith.constant dense<0.000000e+00> : vector<2x8x8xf32>
    %238 = tpu.matmul %235, %236, %cst_53 {dimension_numbers = #tpu.dot_dimension_numbers<[2], [2], [1], [1], [0, 0, 0, 1, 1, 1], [0], [0]>} : vector<2x8x8xf32>, vector<2x8x8xf32>, vector<2x8x8xf32> -> vector<2x8x8xf32>
    "tpu.trace_stop"() : () -> ()
    %cst_54 = arith.constant dense<0xFF800000> : vector<2x8xf32>
    %239 = vector.multi_reduction <maximumf>, %238, %cst_54 [2] : vector<2x8x8xf32> to vector<2x8xf32>
    %cst_55 = arith.constant 0xFF800000 : f32
    %240 = vector.broadcast %cst_55 : f32 to vector<2x8xf32>
    %241 = arith.maximumf %240, %239 : vector<2x8xf32>
    %242 = vector.shape_cast %241 : vector<2x8xf32> to vector<2x8x1xf32>
    %243 = vector.broadcast %242 : vector<2x8x1xf32> to vector<2x8x8xf32>
    %244 = arith.subf %238, %243 : vector<2x8x8xf32>
    %245 = math.exp %244 : vector<2x8x8xf32>
    %cst_56 = arith.constant dense<0.000000e+00> : vector<2x8xf32>
    %246 = vector.multi_reduction <add>, %245, %cst_56 [2] : vector<2x8x8xf32> to vector<2x8xf32>
    %247 = vector.shape_cast %246 : vector<2x8xf32> to vector<2x8x1xf32>
    %248 = vector.broadcast %247 : vector<2x8x1xf32> to vector<2x8x8xf32>
    %249 = arith.divf %245, %248 : vector<2x8x8xf32>
    "tpu.trace_start"() <{level = 10 : i32, message = "bqk,bkd->bqd"}> : () -> ()
    %cst_57 = arith.constant dense<0.000000e+00> : vector<2x8x8xf32>
    %250 = tpu.matmul %249, %237, %cst_57 {dimension_numbers = #tpu.dot_dimension_numbers<[2], [1], [1], [2], [0, 0, 0, 1, 1, 2], [0], [0]>} : vector<2x8x8xf32>, vector<2x8x8xf32>, vector<2x8x8xf32> -> vector<2x8x8xf32>
    "tpu.trace_stop"() : () -> ()
    %cst_58 = arith.constant dense<0.000000e+00> : vector<2x8xf32>
    %251 = vector.multi_reduction <add>, %250, %cst_58 [1] : vector<2x8x8xf32> to vector<2x8xf32>
    %cst_59 = arith.constant 8.000000e+00 : f32
    %252 = vector.broadcast %cst_59 : f32 to vector<2x8xf32>
    %253 = arith.divf %251, %252 : vector<2x8xf32>
    %254 = tpu.concatenate %196, %215, %234, %253 in 1 : vector<2x8xf32>, vector<2x8xf32>, vector<2x8xf32>, vector<2x8xf32> -> vector<2x32xf32>
    %c0_60 = arith.constant 0 : index
    %c0_61 = arith.constant 0 : index
    %255 = vector.load %arg6[%c0_60, %c0_61] : memref<32x32xf32, #tpu.memory_space<vmem>>, vector<32x32xf32>
    %cst_62 = arith.constant dense<0.000000e+00> : vector<2x32xf32>
    %256 = tpu.matmul %254, %255, %cst_62 {dimension_numbers = #tpu.dot_dimension_numbers<[1], [0], [0], [1], [0, 0, 1, 1], [], []>} : vector<2x32xf32>, vector<32x32xf32>, vector<2x32xf32> -> vector<2x32xf32>
    %c0_63 = arith.constant 0 : index
    %c0_64 = arith.constant 0 : index
    %257 = vector.load %arg7[%c0_63, %c0_64] : memref<1x32xf32, #tpu.memory_space<vmem>>, vector<1x32xf32>
    %258 = vector.broadcast %257 : vector<1x32xf32> to vector<2x32xf32>
    %259 = arith.addf %256, %258 : vector<2x32xf32>
    %c0_65 = arith.constant 0 : index
    %c0_66 = arith.constant 0 : index
    %260 = vector.load %arg8[%c0_65, %c0_66] : memref<32x16xf32, #tpu.memory_space<vmem>>, vector<32x16xf32>
    %cst_67 = arith.constant dense<0.000000e+00> : vector<2x16xf32>
    %261 = tpu.matmul %259, %260, %cst_67 {dimension_numbers = #tpu.dot_dimension_numbers<[1], [0], [0], [1], [0, 0, 1, 1], [], []>} : vector<2x32xf32>, vector<32x16xf32>, vector<2x16xf32> -> vector<2x16xf32>
    %c0_68 = arith.constant 0 : index
    %c0_69 = arith.constant 0 : index
    %262 = vector.load %arg9[%c0_68, %c0_69] : memref<1x16xf32, #tpu.memory_space<vmem>>, vector<1x16xf32>
    %263 = vector.broadcast %262 : vector<1x16xf32> to vector<2x16xf32>
    %264 = arith.addf %261, %263 : vector<2x16xf32>
    %cst_70 = arith.constant 0.000000e+00 : f32
    %265 = vector.broadcast %cst_70 : f32 to vector<2x16xf32>
    %266 = arith.maximumf %264, %265 : vector<2x16xf32>
    %c0_71 = arith.constant 0 : index
    %c0_72 = arith.constant 0 : index
    %267 = vector.load %arg10[%c0_71, %c0_72] : memref<16x1xf32, #tpu.memory_space<vmem>>, vector<16x1xf32>
    %cst_73 = arith.constant dense<0.000000e+00> : vector<2x1xf32>
    %268 = tpu.matmul %266, %267, %cst_73 {dimension_numbers = #tpu.dot_dimension_numbers<[1], [0], [0], [1], [0, 0, 1, 1], [], []>} : vector<2x16xf32>, vector<16x1xf32>, vector<2x1xf32> -> vector<2x1xf32>
    %c0_74 = arith.constant 0 : index
    %c0_75 = arith.constant 0 : index
    %269 = vector.load %arg11[%c0_74, %c0_75] : memref<1x1xf32, #tpu.memory_space<vmem>>, vector<1x1xf32>
    %270 = vector.broadcast %269 : vector<1x1xf32> to vector<2x1xf32>
    %271 = arith.addf %268, %270 : vector<2x1xf32>
    %272 = arith.negf %271 : vector<2x1xf32>
    %273 = math.exp %272 : vector<2x1xf32>
    %cst_76 = arith.constant 1.000000e+00 : f32
    %274 = vector.broadcast %cst_76 : f32 to vector<2x1xf32>
    %275 = arith.addf %274, %273 : vector<2x1xf32>
    %276 = arith.divf %274, %275 : vector<2x1xf32>
    %c0_77 = arith.constant 0 : index
    %c0_78 = arith.constant 0 : index
    %277 = vector.load %arg12[%c0_77, %c0_78] : memref<2x1xf32, #tpu.memory_space<vmem>>, vector<2x1xf32>
    tpu.vector_store %arg12[%c0_77, %c0_78], %276 {strides = array<i32>} : memref<2x1xf32, #tpu.memory_space<vmem>>, vector<2x1xf32>,
    return
  }
}

</mosaic_0001>

<bundles_post_ra>
// kernel: feedback_forward.1
= control target key start
LH: loop header
LB: loop body
LE: loop exit
PB: predicated region body
PF: predicated region fallthrough
CT: control target
= control target key end

     0   :  { %vm54_vm0 = vcmask 130048   ;;  %v3595_v0 = vmov 0.0|0.0   ;;  %vm3596_vm1 = vmmov 0   ;;  %v3597_v4 = vmov 0.0   ;;  %s3598_s18 = smov 64   ;;  %s3601_s28 = smov 96   ;;  %s4072_s1 = inlined_call_operand.vmem [shape: f32[16,128], index: 1, kind: input, shape index: {}]   ;;  %s4073_s2 = inlined_call_operand.vmem [shape: f32[32,128], index: 2, kind: input, shape index: {}]   ;;  %s4074_s0 = inlined_call_operand.vmem [shape: f32[16,16], index: 0, kind: input, shape index: {}]   ;;  %s4075_s3 = inlined_call_operand.vmem [shape: f32[1,128], index: 3, kind: input, shape index: {}]   ;;  %s4076_s4 = inlined_call_operand.vmem [shape: f32[32,96], index: 4, kind: input, shape index: {}]   ;;  %s4077_s5 = inlined_call_operand.vmem [shape: f32[1,96], index: 5, kind: input, shape index: {}]   ;;  %s4078_s6 = inlined_call_operand.vmem [shape: f32[32,32], index: 6, kind: input, shape index: {}]   ;;  %s4079_s8 = inlined_call_operand.vmem [shape: f32[32,16], index: 8, kind: input, shape index: {}]   ;;  %s4080_s7 = inlined_call_operand.vmem [shape: f32[1,32], index: 7, kind: input, shape index: {}]   ;;  %s4081_s10 = inlined_call_operand.vmem [shape: f32[16,1], index: 10, kind: input, shape index: {}]   ;;  %s4082_s11 = inlined_call_operand.<no memory space> [shape: f32[1,1], index: 11, kind: input, shape index: {}]   ;;  %s4083_s9 = inlined_call_operand.vmem [shape: f32[1,16], index: 9, kind: input, shape index: {}]   ;;  %s4084_s12 = inlined_call_operand.vmem [shape: f32[2,1], index: 12, kind: output, shape index: {}]  }
   0x1   :  { %3405 = vmatprep.subr.bf16.mxu1 %v3595_v0  ;;  %v45_v1 = vld [vmem:[%s4072_s1] sm:$0xff]  ;;  %v46_v2 = vld [vmem:[%s4072_s1 + $0x8] sm:$0xff]  ;;  %3201 = vmatprep.mubr.msk.f32.mxu1 %vm3596_vm1, %v3597_v4  ;;  %v138_v9 = vld [vmem:[%s4073_s2 + $0x10] sm:$0xff]  ;;  %vm140_vm2 = vcmask 261120   ;;  %v3600_v51 = vmov 1966171168   ;;  %v986_v53 = vlaneseq }
   0x2   :  { %v136_v3 = vld [vmem:[%s4073_s2] sm:$0xff]  ;;  %v3401_v5 = vpack.c.bf16 %v46_v2, %v45_v1  ;;  %v137_v6 = vld [vmem:[%s4073_s2 + $0x8] sm:$0xff]  ;;  %v139_v10 = vld [vmem:[%s4073_s2 + $0x18] sm:$0xff]  ;;  %v984_v52 = vunpack.c.l.s4 %v3600_v51  ;;  %vm1244_vm3 = vcmask 1040384   ;;  %vm1247_vm4 = vcmask 1041408   ;;  %s3603_s29 = smov 120  }
   0x3   :  { %v43_v7 = vld [vmem:[%s4074_s0] sm:$0xff]  ;;  %v3697_v8 = vpack.c.bf16 %v137_v6, %v136_v3  ;;  %v44_v11 = vld [vmem:[%s4074_s0 + $0x8] sm:$0xff]  ;;  %v3710_v12 = vpack.c.bf16 %v139_v10, %v138_v9  ;;  %v987_v55 = vshrl.u32 %v986_v53, 7  ;;  %vm1250_vm5 = vcmask 1042432   ;;  %s3604_s30 = smov 56   ;;  %s3605_s1 = smov 80  }
   0x4   :  { %3190 = vmatprep.mubr.msk.f32.mxu0 %vm54_vm0, %v43_v7  ;;  %3402 = vmatprep.subr.bf16.mxu0 %v3401_v5  ;;  %v3039_v13 = vld [vmem:[%s4075_s3] ss:$0 sm:$0xff]  ;;  %s3599_s3 = smov 32   ;;  %v985_v54 = vunpack.c.0.s8 %v984_v52  ;;  %vm1253_vm6 = vcmask 1043456   ;;  %vm1256_vm7 = vcmask 1044480   ;;  %vm1259_vm8 = vcmask 1045504  }
   0x5   :  { %3407 = vmatpush3.bf16.msra.mxu1 %v3697_v8  ;;  %3404 = vmatpush3.bf16.msra.mxu0 %v3401_v5  ;;  %v3757_v62 = vsub.s32 0, %v987_v55  ;;  %vm1262_vm9 = vcmask 1046528   ;;  %vm1366_vm10 = vcmask 64512   ;;  %vm2751_vm11 = vcmask 1041409   ;;  %s3606_s13 = smov 112   ;;  %s3607_s14 = smov 48  }
   0x6   :  { %3408 = vmatprep.subr.bf16.mxu1 %v3595_v0  ;;  %3411 = vmatprep.subr.bf16.mxu0 %v3595_v0  ;;  %v3753_v56 = vsub.s32 %v985_v54, %v987_v55  ;;  %s3608_s15 = smov 72   ;;  %s3609_s16 = smov 104   ;;  %vm2774_vm12 = vcmask 195584   ;;  %vm3033_vm13 = vcmask 1024  }
   0x7   :  { %s3610_s17 = smov 40   ;;  %s3611_s0 = smov 8  }
   0x8   :  { %3191 = vmatmul.mubr.msk.f32.vlgmr.msra.gmra.mrb[0].mxu0 %vm54_vm0, %v44_v11  ;;  %s3612_s2 = smov 16   ;;  %s3613_s27 = smov 24  }
   0x9   :  { %3410 = vmatpush3.bf16.msra.mxu1 %v3710_v12  ;;  %3413 = vmatpush3.bf16.msra.mxu0 %v3697_v8 }
   0xa   :  { %3414 = vmatprep.subr.bf16.mxu0 %v3595_v0  ;;  %3212 = vmatprep.mubr.msk.f32.mxu0 %vm3596_vm1, %v3597_v4 }
   0xb   :  { %3417 = vmatprep.subr.bf16.mxu1 %v3595_v0 }
   0xc   :  { %3202 = vmatmul.mubr.f32.vlgmr.msra.gmra.mrb[0].mxu1 %v3597_v4 }
   0xd   :  { %3416 = vmatpush3.bf16.msra.mxu0 %v3710_v12  ;;  %3419 = vmatpush3.bf16.msra.mxu1 %v3697_v8 }
   0xe   :  { %3420 = vmatprep.subr.bf16.mxu1 %v3595_v0  ;;  %3223 = vmatprep.mubr.msk.f32.mxu1 %vm3596_vm1, %v3597_v4 }
   0xf   :  { %3423 = vmatprep.subr.bf16.mxu0 %v3595_v0 }
  0x11   :  { %3422 = vmatpush3.bf16.msra.mxu1 %v3710_v12 }
  0x12   :  { %3429 = vmatprep.subr.bf16.mxu1 %v3595_v0 }
  0xdb   :  { %v3192_v14 = vpop.f32.mrb[0].mxu0 }
  0xdc   :  { %v3733_v15 = vadd.f32 %v3192_v14, %v3039_v13  ;;  %v127_v16 = vpop.f32.mrb[1].mxu0 }
  0xdd   :  { %v3735_v17 = vadd.f32 %v3039_v13, %v127_v16 }
  0xdf   :  { %v210_v18 = vpop.f32.mrb[0].mxu1 }
  0xe0   :  { %v214_v19 = vadd.f32 %v210_v18, %v3735_v17  ;;  %v3203_v20 = vpop.f32.mrb[1].mxu1 }
  0xe2   :  { %3495 = vtanh.f32 %v214_v19  ;;  %v3042_v22 = vmul.f32 -1.442695, %v214_v19 }
  0xe4   :  { %3497 = vpow2.f32 %v3042_v22 }
  0xec   :  { %v3496_v21 = vpop.eup %3495 }
  0xed   :  { %224 = vrot.lane.b32.xlu0 %v3496_v21, %s3598_s18 }
  0xee   :  { %v3498_v23 = vpop.eup %3497 }
  0xef   :  { %v218_v24 = vadd.f32 1.0, %v3498_v23 }
  0xf1   :  { %3499 = vrcp.f32 %v218_v24 }
  0xfb   :  { %v3500_v25 = vpop.eup %3499 }
  0xfc   :  { %v222_v28 = vmul.f32 0.0, %v3500_v25 }
 0x15f   :  { %v225_v26 = vpop.permute.xlu0 %224 }
 0x160   :  { %v227_v27 = vmul.f32 %v3500_v25, %v225_v26 }
 0x162   :  { %229 = vrot.lane.b32.xlu0 %v227_v27, %s3599_s3 }
 0x1d4   :  { %v230_v29 = vpop.permute.xlu0 %229 }
 0x1d5   :  { %v232_v30 = vadd.f32 %v230_v29, %v222_v28 }
 0x1d7   :  { %3501 = vtanh.f32 %v232_v30  ;;  %v326_v46 = vrot.slane %v232_v30, 6 }
 0x1e1   :  { %v3502_v31 = vpop.eup %3501 }
 0x1e2   :  { %235 = vrot.lane.b32.xlu1 %v3502_v31, %s3598_s18 }
 0x254   :  { %v236_v32 = vpop.permute.xlu1 %235 }
 0x255   :  { %v238_v33 = vmul.f32 %v3500_v25, %v236_v32 }
 0x257   :  { %240 = vrot.lane.b32.xlu1 %v238_v33, %s3599_s3  ;;  %v989_v59 = vrot.slane %v238_v33, %v3753_v56 }
 0x259   :  { %v990_v2 = vcombine.high %v989_v59, %v989_v59  ;;  %v997_v6 = vrot.slane %v989_v59, %v3753_v56 }
 0x25b   :  { %v1004_v10 = vrot.slane %v990_v2, %v3753_v56 }
 0x2c9   :  { %v241_v34 = vpop.permute.xlu1 %240 }
 0x2ca   :  { %3213 = vmatmul.mubr.msk.f32.vlgmr.msra.gmra.mrb[2].mxu0 %vm140_vm2, %v241_v34 }
 0x2cb   :  { %3425 = vmatpush3.bf16.msra.mxu0 %v3697_v8  ;;  %3234 = vmatprep.mubr.msk.f32.mxu0 %vm3596_vm1, %v3597_v4 }
 0x2cc   :  { %3426 = vmatprep.subr.bf16.mxu0 %v3595_v0 }
 0x2cf   :  { %3428 = vmatpush3.bf16.msra.mxu0 %v3710_v12 }
 0x2d0   :  { %3435 = vmatprep.subr.bf16.mxu0 %v3595_v0 }
 0x39d   :  { %v310_v35 = vpop.f32.mrb[2].mxu0 }
 0x39e   :  { %v315_v36 = vrot.slane %v310_v35, 6  ;;  %v3214_v37 = vpop.f32.mrb[3].mxu0 }
 0x3a0   :  { %v317_v38 = vadd.f32 %v315_v36, %v3735_v17 }
 0x3a2   :  { %3503 = vtanh.f32 %v317_v38  ;;  %v3044_v40 = vmul.f32 -1.442695, %v317_v38 }
 0x3a4   :  { %3505 = vpow2.f32 %v3044_v40 }
 0x3ac   :  { %v3504_v39 = vpop.eup %3503 }
 0x3ad   :  { %330 = vrot.lane.b32.xlu0 %v3504_v39, %s3598_s18 }
 0x3ae   :  { %v3506_v41 = vpop.eup %3505 }
 0x3af   :  { %v321_v42 = vadd.f32 1.0, %v3506_v41 }
 0x3b1   :  { %3507 = vrcp.f32 %v321_v42 }
 0x3bb   :  { %v3508_v43 = vpop.eup %3507 }
 0x3bc   :  { %v328_v47 = vmul.f32 %v3508_v43, %v326_v46 }
 0x41f   :  { %v331_v44 = vpop.permute.xlu0 %330 }
 0x420   :  { %v333_v45 = vmul.f32 %v3508_v43, %v331_v44 }
 0x422   :  { %335 = vrot.lane.b32.xlu1 %v333_v45, %s3599_s3 }
 0x494   :  { %v336_v48 = vpop.permute.xlu1 %335 }
 0x495   :  { %v338_v49 = vadd.f32 %v336_v48, %v328_v47 }
 0x497   :  { %3509 = vtanh.f32 %v338_v49  ;;  %v433_v29 = vrot.slane %v338_v49, 6 }
 0x4a1   :  { %v3510_v50 = vpop.eup %3509 }
 0x4a2   :  { %341 = vrot.lane.b32.xlu0 %v3510_v50, %s3598_s18 }
 0x514   :  { %v342_v57 = vpop.permute.xlu0 %341 }
 0x515   :  { %v344_v58 = vmul.f32 %v3508_v43, %v342_v57 }
 0x517   :  { %v346_v60 = vrot.slane %v344_v58, 2  ;;  %v1013_v61 = vrot.slane %v344_v58, %v3753_v56 }
 0x519   :  { %v1014_v63 = vcombine.high %v1013_v61, %v1013_v61  ;;  %v1021_v1 = vrot.slane %v1013_v61, %v3753_v56  ;;  %347 = vrot.lane.b32.xlu1 %v346_v60, %s3599_s3 }
 0x51b   :  { %v1028_v3 = vrot.slane %v1014_v63, %v3753_v56  ;;  %v1029_v5 = vcombine.high %v1021_v1, %v1021_v1 }
 0x51d   :  { %v1030_v7 = vcombine.high %v1028_v3, %v1028_v3  ;;  %v1177_v9 = vrot.slane %v1029_v5, %v3757_v62 }
 0x51f   :  { %v1181_v11 = vrot.slane %v1030_v7, %v3757_v62  ;;  %v1245_v13 = vsel %vm1244_vm3, %v997_v6, %v1177_v9 }
 0x521   :  { %v1246_v14 = vsel %vm1244_vm3, %v1004_v10, %v1181_v11 }
 0x58b   :  { %v348_v16 = vpop.permute.xlu1 %347 }
 0x58c   :  { %3224 = vmatmul.mubr.msk.f32.vlgmr.msra.gmra.mrb[2].mxu1 %vm140_vm2, %v348_v16 }
 0x58d   :  { %3431 = vmatpush3.bf16.msra.mxu1 %v3697_v8  ;;  %3245 = vmatprep.mubr.msk.f32.mxu1 %vm3596_vm1, %v3597_v4 }
 0x58e   :  { %3432 = vmatprep.subr.bf16.mxu1 %v3595_v0 }
 0x591   :  { %3434 = vmatpush3.bf16.msra.mxu1 %v3710_v12 }
 0x592   :  { %3441 = vmatprep.subr.bf16.mxu1 %v3595_v0 }
 0x65f   :  { %v417_v18 = vpop.f32.mrb[2].mxu1 }
 0x660   :  { %v422_v19 = vrot.slane %v417_v18, 4  ;;  %v3225_v20 = vpop.f32.mrb[3].mxu1 }
 0x662   :  { %v424_v21 = vadd.f32 %v422_v19, %v3735_v17 }
 0x664   :  { %3511 = vtanh.f32 %v424_v21  ;;  %v3046_v23 = vmul.f32 -1.442695, %v424_v21 }
 0x666   :  { %3513 = vpow2.f32 %v3046_v23 }
 0x66e   :  { %v3512_v22 = vpop.eup %3511 }
 0x66f   :  { %437 = vrot.lane.b32.xlu0 %v3512_v22, %s3598_s18 }
 0x670   :  { %v3514_v24 = vpop.eup %3513 }
 0x671   :  { %v428_v25 = vadd.f32 1.0, %v3514_v24 }
 0x673   :  { %3515 = vrcp.f32 %v428_v25 }
 0x67d   :  { %v3516_v26 = vpop.eup %3515 }
 0x67e   :  { %v435_v30 = vmul.f32 %v3516_v26, %v433_v29 }
 0x6e1   :  { %v438_v27 = vpop.permute.xlu0 %437 }
 0x6e2   :  { %v440_v28 = vmul.f32 %v3516_v26, %v438_v27 }
 0x6e4   :  { %442 = vrot.lane.b32.xlu1 %v440_v28, %s3599_s3 }
 0x756   :  { %v443_v31 = vpop.permute.xlu1 %442 }
 0x757   :  { %v445_v32 = vadd.f32 %v443_v31, %v435_v30 }
 0x759   :  { %3517 = vtanh.f32 %v445_v32  ;;  %v540_v59 = vrot.slane %v445_v32, 6 }
 0x763   :  { %v3518_v33 = vpop.eup %3517 }
 0x764   :  { %448 = vrot.lane.b32.xlu0 %v3518_v33, %s3598_s18 }
 0x7d6   :  { %v449_v34 = vpop.permute.xlu0 %448 }
 0x7d7   :  { %v451_v35 = vmul.f32 %v3516_v26, %v449_v34 }
 0x7d9   :  { %v453_v36 = vrot.slane %v451_v35, 4  ;;  %v1031_v37 = vcombine.high %v451_v35, %v451_v35 }
 0x7db   :  { %v1038_v38 = vrot.slane %v1031_v37, %v3753_v56  ;;  %454 = vrot.lane.b32.xlu1 %v453_v36, %s3599_s3 }
 0x7dd   :  { %v1039_v39 = vcombine.high %v1038_v38, %v1038_v38  ;;  %v1046_v40 = vrot.slane %v1038_v38, %v3753_v56 }
 0x7df   :  { %v1053_v41 = vrot.slane %v1039_v39, %v3753_v56  ;;  %v1187_v42 = vrot.slane %v1046_v40, %v3757_v62 }
 0x7e1   :  { %v1191_v43 = vrot.slane %v1053_v41, %v3757_v62  ;;  %v1248_v44 = vsel %vm1247_vm4, %v1245_v13, %v1187_v42 }
 0x7e3   :  { %v1249_v45 = vsel %vm1247_vm4, %v1246_v14, %v1191_v43 }
 0x84d   :  { %v455_v46 = vpop.permute.xlu1 %454 }
 0x84e   :  { %3235 = vmatmul.mubr.msk.f32.vlgmr.msra.gmra.mrb[4].mxu0 %vm140_vm2, %v455_v46 }
 0x84f   :  { %3437 = vmatpush3.bf16.msra.mxu0 %v3697_v8  ;;  %3256 = vmatprep.mubr.msk.f32.mxu0 %vm3596_vm1, %v3597_v4 }
 0x850   :  { %3438 = vmatprep.subr.bf16.mxu0 %v3595_v0 }
 0x853   :  { %3440 = vmatpush3.bf16.msra.mxu0 %v3710_v12 }
 0x854   :  { %3447 = vmatprep.subr.bf16.mxu0 %v3595_v0 }
 0x921   :  { %v524_v47 = vpop.f32.mrb[4].mxu0 }
 0x922   :  { %v529_v48 = vrot.slane %v524_v47, 2  ;;  %v3236_v49 = vpop.f32.mrb[5].mxu0 }
 0x924   :  { %v531_v50 = vadd.f32 %v529_v48, %v3735_v17 }
 0x926   :  { %3519 = vtanh.f32 %v531_v50  ;;  %v3048_v52 = vmul.f32 -1.442695, %v531_v50 }
 0x928   :  { %3521 = vpow2.f32 %v3048_v52 }
 0x930   :  { %v3520_v51 = vpop.eup %3519 }
 0x931   :  { %544 = vrot.lane.b32.xlu0 %v3520_v51, %s3598_s18 }
 0x932   :  { %v3522_v53 = vpop.eup %3521 }
 0x933   :  { %v535_v54 = vadd.f32 1.0, %v3522_v53 }
 0x935   :  { %3523 = vrcp.f32 %v535_v54 }
 0x93f   :  { %v3524_v55 = vpop.eup %3523 }
 0x940   :  { %v542_v60 = vmul.f32 %v3524_v55, %v540_v59 }
 0x9a3   :  { %v545_v57 = vpop.permute.xlu0 %544 }
 0x9a4   :  { %v547_v58 = vmul.f32 %v3524_v55, %v545_v57 }
 0x9a6   :  { %549 = vrot.lane.b32.xlu1 %v547_v58, %s3599_s3 }
 0xa18   :  { %v550_v61 = vpop.permute.xlu1 %549 }
 0xa19   :  { %v552_v63 = vadd.f32 %v550_v61, %v542_v60 }
 0xa1b   :  { %3525 = vtanh.f32 %v552_v63  ;;  %v644_v31 = vrot.slane %v552_v63, 6 }
 0xa25   :  { %v3526_v17 = vpop.eup %3525 }
 0xa26   :  { %555 = vrot.lane.b32.xlu0 %v3526_v17, %s3598_s18 }
 0xa98   :  { %v556_v1 = vpop.permute.xlu0 %555 }
 0xa99   :  { %v558_v2 = vmul.f32 %v3524_v55, %v556_v1 }
 0xa9b   :  { %v560_v3 = vrot.slane %v558_v2, 6  ;;  %v1054_v5 = vcombine.high %v558_v2, %v558_v2 }
 0xa9d   :  { %v1061_v6 = vrot.slane %v1054_v5, %v3753_v56  ;;  %561 = vrot.lane.b32.xlu1 %v560_v3, %s3599_s3 }
 0xa9f   :  { %v1062_v7 = vcombine.high %v1061_v6, %v1061_v6  ;;  %v1069_v9 = vrot.slane %v1061_v6, %v3753_v56 }
 0xaa1   :  { %v1076_v10 = vrot.slane %v1062_v7, %v3753_v56  ;;  %v1077_v11 = vcombine.high %v1069_v9, %v1069_v9 }
 0xaa3   :  { %v1078_v13 = vcombine.high %v1076_v10, %v1076_v10  ;;  %v1197_v14 = vrot.slane %v1077_v11, %v3757_v62 }
 0xaa5   :  { %v1201_v16 = vrot.slane %v1078_v13, %v3757_v62  ;;  %v1251_v18 = vsel %vm1250_vm5, %v1248_v44, %v1197_v14 }
 0xaa7   :  { %v1252_v19 = vsel %vm1250_vm5, %v1249_v45, %v1201_v16 }
 0xb0f   :  { %v562_v20 = vpop.permute.xlu1 %561 }
 0xb10   :  { %3246 = vmatmul.mubr.msk.f32.vlgmr.msra.gmra.mrb[4].mxu1 %vm140_vm2, %v562_v20 }
 0xb11   :  { %3443 = vmatpush3.bf16.msra.mxu1 %v3697_v8  ;;  %3267 = vmatprep.mubr.msk.f32.mxu1 %vm3596_vm1, %v3597_v4 }
 0xb12   :  { %3444 = vmatprep.subr.bf16.mxu1 %v3595_v0 }
 0xb15   :  { %3446 = vmatpush3.bf16.msra.mxu1 %v3710_v12 }
 0xbe3   :  { %v631_v21 = vpop.f32.mrb[4].mxu1 }
 0xbe4   :  { %v635_v22 = vadd.f32 %v631_v21, %v3733_v15  ;;  %v3247_v23 = vpop.f32.mrb[5].mxu1 }
 0xbe6   :  { %3527 = vtanh.f32 %v635_v22  ;;  %v3050_v25 = vmul.f32 -1.442695, %v635_v22 }
 0xbe8   :  { %3529 = vpow2.f32 %v3050_v25 }
 0xbf0   :  { %v3528_v24 = vpop.eup %3527 }
 0xbf1   :  { %648 = vrot.lane.b32.xlu0 %v3528_v24, %s3598_s18 }
 0xbf2   :  { %v3530_v26 = vpop.eup %3529 }
 0xbf3   :  { %v639_v27 = vadd.f32 1.0, %v3530_v26 }
 0xbf5   :  { %3531 = vrcp.f32 %v639_v27 }
 0xbff   :  { %v3532_v28 = vpop.eup %3531 }
 0xc00   :  { %v646_v32 = vmul.f32 %v3532_v28, %v644_v31 }
 0xc63   :  { %v649_v29 = vpop.permute.xlu0 %648 }
 0xc64   :  { %v651_v30 = vmul.f32 %v3532_v28, %v649_v29 }
 0xc66   :  { %653 = vrot.lane.b32.xlu1 %v651_v30, %s3599_s3 }
 0xcd8   :  { %v654_v33 = vpop.permute.xlu1 %653 }
 0xcd9   :  { %v656_v34 = vadd.f32 %v654_v33, %v646_v32 }
 0xcdb   :  { %3533 = vtanh.f32 %v656_v34 }
 0xce5   :  { %v3534_v35 = vpop.eup %3533 }
 0xce6   :  { %659 = vrot.lane.b32.xlu0 %v3534_v35, %s3598_s18 }
 0xd58   :  { %v660_v36 = vpop.permute.xlu0 %659 }
 0xd59   :  { %v662_v37 = vmul.f32 %v3532_v28, %v660_v36 }
 0xd5b   :  { %v1085_v38 = vrot.slane %v662_v37, %v3753_v56  ;;  %664 = vrot.lane.b32.xlu1 %v662_v37, %s3599_s3 }
 0xd5d   :  { %v1086_v39 = vcombine.high %v1085_v38, %v1085_v38  ;;  %v1093_v40 = vrot.slane %v1085_v38, %v3753_v56 }
 0xd5f   :  { %v1100_v41 = vrot.slane %v1086_v39, %v3753_v56  ;;  %v1207_v42 = vrot.slane %v1093_v40, %v3757_v62 }
 0xd61   :  { %v1211_v43 = vrot.slane %v1100_v41, %v3757_v62  ;;  %v1254_v44 = vsel %vm1253_vm6, %v1251_v18, %v1207_v42 }
 0xd63   :  { %v1255_v45 = vsel %vm1253_vm6, %v1252_v19, %v1211_v43 }
 0xdcd   :  { %v665_v46 = vpop.permute.xlu1 %664 }
 0xdce   :  { %3257 = vmatmul.mubr.msk.f32.vlgmr.msra.gmra.mrb[6].mxu0 %vm140_vm2, %v665_v46 }
 0xdcf   :  { %3449 = vmatpush3.bf16.msra.mxu0 %v3697_v8  ;;  %3278 = vmatprep.mubr.msk.f32.mxu0 %vm3596_vm1, %v3597_v4 }
 0xdd0   :  { %3450 = vmatprep.subr.bf16.mxu0 %v3595_v0 }
 0xdd3   :  { %3452 = vmatpush3.bf16.msra.mxu0 %v3710_v12  ;;  %v750_v12 = vrot.slane %v656_v34, 6 }
 0xdd4   :  { %3292 = vmatprep.subr.mxu0 %v3597_v4 }
 0xea1   :  { %v734_v47 = vpop.f32.mrb[6].mxu0 }
 0xea2   :  { %v739_v48 = vrot.slane %v734_v47, 6  ;;  %v3258_v49 = vpop.f32.mrb[7].mxu0 }
 0xea4   :  { %v741_v50 = vadd.f32 %v739_v48, %v3733_v15 }
 0xea6   :  { %3535 = vtanh.f32 %v741_v50  ;;  %v3052_v52 = vmul.f32 -1.442695, %v741_v50 }
 0xea8   :  { %3537 = vpow2.f32 %v3052_v52 }
 0xeb0   :  { %v3536_v51 = vpop.eup %3535 }
 0xeb1   :  { %754 = vrot.lane.b32.xlu0 %v3536_v51, %s3598_s18 }
 0xeb2   :  { %v3538_v8 = vpop.eup %3537 }
 0xeb3   :  { %v745_v53 = vadd.f32 1.0, %v3538_v8 }
 0xeb5   :  { %3539 = vrcp.f32 %v745_v53 }
 0xebf   :  { %v3540_v54 = vpop.eup %3539 }
 0xec0   :  { %v752_v58 = vmul.f32 %v3540_v54, %v750_v12 }
 0xf23   :  { %v755_v55 = vpop.permute.xlu0 %754 }
 0xf24   :  { %v757_v57 = vmul.f32 %v3540_v54, %v755_v55 }
 0xf26   :  { %759 = vrot.lane.b32.xlu1 %v757_v57, %s3599_s3 }
 0xf98   :  { %v760_v59 = vpop.permute.xlu1 %759 }
 0xf99   :  { %v762_v60 = vadd.f32 %v760_v59, %v752_v58 }
 0xf9b   :  { %3541 = vtanh.f32 %v762_v60  ;;  %v857_v29 = vrot.slane %v762_v60, 6 }
 0xfa5   :  { %v3542_v61 = vpop.eup %3541 }
 0xfa6   :  { %765 = vrot.lane.b32.xlu0 %v3542_v61, %s3598_s18  ;;  %v1265_v61 = vld [vmem:[%s4076_s4] sm:$0xff] }
0x1018   :  { %v766_v63 = vpop.permute.xlu0 %765 }
0x1019   :  { %v768_v17 = vmul.f32 %v3540_v54, %v766_v63  ;;  %v1266_v63 = vld [vmem:[%s4076_s4 + $0x8] sm:$0xff] }
0x101b   :  { %v770_v1 = vrot.slane %v768_v17, 2  ;;  %v1107_v2 = vrot.slane %v768_v17, %v3753_v56  ;;  %v1267_v17 = vld [vmem:[%s4076_s4 + $0x10] sm:$0xff] }
0x101d   :  { %v1108_v3 = vcombine.high %v1107_v2, %v1107_v2  ;;  %v1115_v5 = vrot.slane %v1107_v2, %v3753_v56  ;;  %771 = vrot.lane.b32.xlu1 %v770_v1, %s3599_s3  ;;  %v3453_v1 = vpack.c.bf16 %v1266_v63, %v1265_v61  ;;  %v1268_v2 = vld [vmem:[%s4076_s4 + $0x18] sm:$0xff] }
0x101f   :  { %v1122_v6 = vrot.slane %v1108_v3, %v3753_v56  ;;  %v1123_v7 = vcombine.high %v1115_v5, %v1115_v5  ;;  %v3457_v3 = vpack.c.bf16 %v1268_v2, %v1267_v17  ;;  %3454 = vmatprep.subr.bf16.mxu1 %v3453_v1 }
0x1021   :  { %v1124_v9 = vcombine.high %v1122_v6, %v1122_v6  ;;  %v1217_v10 = vrot.slane %v1123_v7, %v3757_v62 }
0x1023   :  { %v1221_v11 = vrot.slane %v1124_v9, %v3757_v62  ;;  %v1257_v13 = vsel %vm1256_vm7, %v1254_v44, %v1217_v10 }
0x1025   :  { %v1258_v14 = vsel %vm1256_vm7, %v1255_v45, %v1221_v11 }
0x108f   :  { %v772_v16 = vpop.permute.xlu1 %771 }
0x1090   :  { %3268 = vmatmul.mubr.msk.f32.vlgmr.msra.gmra.mrb[6].mxu1 %vm140_vm2, %v772_v16 }
0x1091   :  { %3456 = vmatpush3.bf16.msra.mxu1 %v3453_v1 }
0x1092   :  { %3458 = vmatprep.subr.bf16.mxu1 %v3457_v3 }
0x1095   :  { %3460 = vmatpush3.bf16.msra.mxu1 %v3457_v3 }
0x1096   :  { %3302 = vmatprep.subr.mxu1 %v3597_v4 }
0x1163   :  { %v841_v18 = vpop.f32.mrb[6].mxu1 }
0x1164   :  { %v846_v19 = vrot.slane %v841_v18, 4  ;;  %v3269_v20 = vpop.f32.mrb[7].mxu1 }
0x1166   :  { %v848_v21 = vadd.f32 %v846_v19, %v3733_v15 }
0x1168   :  { %3543 = vtanh.f32 %v848_v21  ;;  %v3054_v23 = vmul.f32 -1.442695, %v848_v21 }
0x116a   :  { %3545 = vpow2.f32 %v3054_v23 }
0x1172   :  { %v3544_v22 = vpop.eup %3543 }
0x1173   :  { %861 = vrot.lane.b32.xlu0 %v3544_v22, %s3598_s18 }
0x1174   :  { %v3546_v24 = vpop.eup %3545 }
0x1175   :  { %v852_v25 = vadd.f32 1.0, %v3546_v24 }
0x1177   :  { %3547 = vrcp.f32 %v852_v25 }
0x1181   :  { %v3548_v26 = vpop.eup %3547 }
0x1182   :  { %v859_v30 = vmul.f32 %v3548_v26, %v857_v29 }
0x11e5   :  { %v862_v27 = vpop.permute.xlu0 %861 }
0x11e6   :  { %v864_v28 = vmul.f32 %v3548_v26, %v862_v27 }
0x11e8   :  { %866 = vrot.lane.b32.xlu1 %v864_v28, %s3599_s3 }
0x125a   :  { %v867_v31 = vpop.permute.xlu1 %866 }
0x125b   :  { %v869_v32 = vadd.f32 %v867_v31, %v859_v30 }
0x125d   :  { %3549 = vtanh.f32 %v869_v32  ;;  %v964_v12 = vrot.slane %v869_v32, 6 }
0x1267   :  { %v3550_v33 = vpop.eup %3549 }
0x1268   :  { %872 = vrot.lane.b32.xlu0 %v3550_v33, %s3598_s18 }
0x12da   :  { %v873_v34 = vpop.permute.xlu0 %872 }
0x12db   :  { %v875_v35 = vmul.f32 %v3548_v26, %v873_v34 }
0x12dd   :  { %v877_v36 = vrot.slane %v875_v35, 4  ;;  %v1125_v37 = vcombine.high %v875_v35, %v875_v35 }
0x12df   :  { %v1132_v38 = vrot.slane %v1125_v37, %v3753_v56  ;;  %878 = vrot.lane.b32.xlu1 %v877_v36, %s3599_s3 }
0x12e1   :  { %v1133_v39 = vcombine.high %v1132_v38, %v1132_v38  ;;  %v1140_v40 = vrot.slane %v1132_v38, %v3753_v56 }
0x12e3   :  { %v1147_v41 = vrot.slane %v1133_v39, %v3753_v56  ;;  %v1227_v42 = vrot.slane %v1140_v40, %v3757_v62 }
0x12e5   :  { %v1260_v43 = vsel %vm1259_vm8, %v1257_v13, %v1227_v42  ;;  %v1231_v44 = vrot.slane %v1147_v41, %v3757_v62 }
0x12e7   :  { %v1261_v45 = vsel %vm1259_vm8, %v1258_v14, %v1231_v44 }
0x1351   :  { %v879_v46 = vpop.permute.xlu1 %878 }
0x1352   :  { %3279 = vmatmul.mubr.msk.f32.vlgmr.msra.gmra.mrb[8].mxu0 %vm140_vm2, %v879_v46 }
0x1353   :  { %3294 = vmatprep.mubr.msk.f32.mxu0 %vm3596_vm1, %v3597_v4 }
0x1425   :  { %v948_v47 = vpop.f32.mrb[8].mxu0 }
0x1426   :  { %v953_v48 = vrot.slane %v948_v47, 2  ;;  %v3280_v49 = vpop.f32.mrb[9].mxu0 }
0x1428   :  { %v955_v50 = vadd.f32 %v953_v48, %v3733_v15 }
0x142a   :  { %3551 = vtanh.f32 %v955_v50  ;;  %v3056_v52 = vmul.f32 -1.442695, %v955_v50 }
0x142c   :  { %3553 = vpow2.f32 %v3056_v52 }
0x1434   :  { %v3552_v51 = vpop.eup %3551 }
0x1435   :  { %968 = vrot.lane.b32.xlu0 %v3552_v51, %s3598_s18 }
0x1436   :  { %v3554_v8 = vpop.eup %3553 }
0x1437   :  { %v959_v53 = vadd.f32 1.0, %v3554_v8 }
0x1439   :  { %3555 = vrcp.f32 %v959_v53 }
0x1443   :  { %v3556_v54 = vpop.eup %3555 }
0x1444   :  { %v966_v58 = vmul.f32 %v3556_v54, %v964_v12 }
0x14a7   :  { %v969_v55 = vpop.permute.xlu0 %968 }
0x14a8   :  { %v971_v57 = vmul.f32 %v3556_v54, %v969_v55 }
0x14aa   :  { %973 = vrot.lane.b32.xlu1 %v971_v57, %s3599_s3 }
0x151c   :  { %v974_v59 = vpop.permute.xlu1 %973 }
0x151d   :  { %v976_v60 = vadd.f32 %v974_v59, %v966_v58 }
0x151f   :  { %3557 = vtanh.f32 %v976_v60 }
0x1529   :  { %v3558_v15 = vpop.eup %3557 }
0x152a   :  { %979 = vrot.lane.b32.xlu0 %v3558_v15, %s3598_s18 }
0x159c   :  { %v980_v5 = vpop.permute.xlu0 %979 }
0x159d   :  { %v982_v6 = vmul.f32 %v3556_v54, %v980_v5 }
0x159f   :  { %v1149_v7 = vcombine.high %v982_v6, %v982_v6 }
0x15a1   :  { %v1156_v9 = vrot.slane %v1149_v7, %v3753_v56 }
0x15a3   :  { %v1157_v10 = vcombine.high %v1156_v9, %v1156_v9  ;;  %v1164_v11 = vrot.slane %v1156_v9, %v3753_v56 }
0x15a5   :  { %v1171_v13 = vrot.slane %v1157_v10, %v3753_v56  ;;  %v1172_v14 = vcombine.high %v1164_v11, %v1164_v11  ;;  %v3057_v56 = vld [vmem:[%s4077_s5] ss:$0 sm:$0xff]  ;;  %s3602_s5 = smov 88  }
0x15a7   :  { %v1173_v16 = vcombine.high %v1171_v13, %v1171_v13  ;;  %v1237_v18 = vrot.slane %v1172_v14, %v3757_v62 }
0x15a9   :  { %v1263_v19 = vsel %vm1262_vm9, %v1260_v43, %v1237_v18  ;;  %v1241_v20 = vrot.slane %v1173_v16, %v3757_v62 }
0x15aa   :  { %1278 = vrot.lane.b32.xlu1 %v1263_v19, %s3599_s3 }
0x15ab   :  { %v1264_v21 = vsel %vm1262_vm9, %v1261_v45, %v1241_v20 }
0x15ac   :  { %1280 = vrot.lane.b32.xlu0 %v1264_v21, %s3599_s3 }
0x161c   :  { %v1279_v22 = vpop.permute.xlu1 %1278 }
0x161d   :  { %3289 = vmatprep.mubr.msk.f32.mxu1 %vm140_vm2, %v1279_v22 }
0x161e   :  { %v1281_v23 = vpop.permute.xlu0 %1280 }
0x161f   :  { %3290 = vmatmul.mubr.msk.f32.vlgmr.msra.gmra.mrb[8].mxu1 %vm140_vm2, %v1281_v23 }
0x1620   :  { %3304 = vmatprep.mubr.msk.f32.mxu1 %vm3596_vm1, %v3597_v4 }
0x16f2   :  { %v3291_v24 = vpop.f32.mrb[8].mxu1 }
0x16f3   :  { %v3878_v62 = vadd.f32 %v3291_v24, %v3057_v56  ;;  %v1352_v25 = vpop.f32.mrb[9].mxu1 }
0x16f4   :  { %v3880_v26 = vadd.f32 %v3057_v56, %v1352_v25 }
0x16f5   :  { %1443 = vrot.lane.b32.xlu0 %v3878_v62, %s3601_s28  ;;  %v3895_v30 = vmul.f32 0.35355338, %v3878_v62 }
0x16f6   :  { %1364 = vrot.lane.b32.xlu1 %v3880_v26, %s3601_s28  ;;  %v3886_v28 = vmul.f32 0.35355338, %v3880_v26 }
0x1767   :  { %v1444_v29 = vpop.permute.xlu0 %1443 }
0x1768   :  { %v1365_v27 = vpop.permute.xlu1 %1364 }
0x1769   :  { %3293 = vmatpush3.xpose.msk.msra.mxu0 %vm1366_vm10, %v1365_v27 }
0x176a   :  { %3297 = vmatprep.subr.mxu0 %v3597_v4 }
0x176c   :  { %3295 = vmatmul.mubr.msk.f32.vlgmr.msra.gmra.mrb[10].mxu0 %vm1366_vm10, %v3886_v28 }
0x176d   :  { %3298 = vmatpush3.xpose.msk.msra.mxu0 %vm1366_vm10, %v1444_v29  ;;  %3299 = vmatprep.mubr.msk.f32.mxu0 %vm3596_vm1, %v3597_v4 }
0x176e   :  { %3307 = vmatprep.subr.mxu0 %v3597_v4 }
0x1770   :  { %3300 = vmatmul.mubr.msk.f32.vlgmr.msra.gmra.mrb[12].mxu0 %vm1366_vm10, %v3895_v30 }
0x1771   :  { %3309 = vmatprep.mubr.msk.f32.mxu0 %vm3596_vm1, %v3597_v4 }
0x183f   :  { %v1438_v31 = vpop.f32.mrb[10].mxu0 }
0x1840   :  { %v3296_v32 = vpop.f32.mrb[11].mxu0  ;;  %v1520_v33 = vsel %vm1366_vm10, %v1438_v31, -inf }
0x1841   :  { %1521 = vmax.xlane.f32.xlu1 %v1520_v33 }
0x1843   :  { %v1516_v34 = vpop.f32.mrb[12].mxu0 }
0x1844   :  { %v3301_v35 = vpop.f32.mrb[13].mxu0  ;;  %v1523_v36 = vsel %vm1366_vm10, %v1516_v34, -inf }
0x1845   :  { %1524 = vmax.xlane.f32.xlu0 %v1523_v36 }
0x1852   :  { %1618 = vrot.lane.b32.xlu1 %v3878_v62, %s3598_s18 }
0x1856   :  { %1713 = vrot.lane.b32.xlu1 %v3880_v26, %s3602_s5 }
0x185b   :  { %1542 = vrot.lane.b32.xlu0 %v3880_v26, %s3598_s18 }
0x185f   :  { %1791 = vrot.lane.b32.xlu0 %v3878_v62, %s3602_s5 }
0x18ce   :  { %v1522_v37 = vpop.xlane.xlu1 %1521 }
0x18cf   :  { %v1526_v38 = vsub.f32 %v1438_v31, %v1522_v37 }
0x18d1   :  { %v1528_v39 = vmul.f32 1.442695, %v1526_v38 }
0x18d2   :  { %v1619_v40 = vpop.permute.xlu1 %1618  ;;  %v1525_v41 = vpop.xlane.xlu0 %1524 }
0x18d3   :  { %3559 = vpow2.f32 %v1528_v39  ;;  %v1527_v42 = vsub.f32 %v1516_v34, %v1525_v41  ;;  %3308 = vmatpush3.msra.mxu0 %v1619_v40 }
0x18d4   :  { %3317 = vmatprep.subr.mxu0 %v3597_v4 }
0x18d5   :  { %v1530_v43 = vmul.f32 1.442695, %v1527_v42 }
0x18d6   :  { %v1543_v44 = vpop.permute.xlu0 %1542  ;;  %v1714_v50 = vpop.permute.xlu1 %1713 }
0x18d7   :  { %3561 = vpow2.f32 %v1530_v43  ;;  %3303 = vmatpush3.msra.mxu1 %v1543_v44 }
0x18d8   :  { %3312 = vmatprep.subr.mxu1 %v3597_v4 }
0x18da   :  { %v1792_v49 = vpop.permute.xlu0 %1791 }
0x18dd   :  { %v3560_v45 = vpop.eup %3559 }
0x18de   :  { %v1532_v46 = vsel %vm1366_vm10, %v3560_v45, 0.0 }
0x18df   :  { %1533 = vadd.xlane.f32.xlu0 %v1532_v46 }
0x18e1   :  { %v3562_v47 = vpop.eup %3561 }
0x18e2   :  { %v1535_v48 = vsel %vm1366_vm10, %v3562_v47, 0.0 }
0x18e3   :  { %1536 = vadd.xlane.f32.xlu1 %v1535_v48 }
0x18f4   :  { %1711 = vrot.lane.b32.xlu1 %v3886_v28, %s3603_s29 }
0x18f5   :  { %1789 = vrot.lane.b32.xlu0 %v3895_v30, %s3603_s29 }
0x196c   :  { %v1534_v51 = vpop.xlane.xlu0 %1533 }
0x196d   :  { %3563 = vrcp.f32 %v1534_v51 }
0x1970   :  { %v1537_v52 = vpop.xlane.xlu1 %1536  ;;  %v1790_v12 = vpop.permute.xlu0 %1789 }
0x1971   :  { %3565 = vrcp.f32 %v1537_v52 }
0x1974   :  { %v1712_v57 = vpop.permute.xlu1 %1711 }
0x1977   :  { %v3564_v8 = vpop.eup %3563 }
0x1978   :  { %v1539_v53 = vmul.f32 %v3564_v8, %v3560_v45 }
0x197a   :  { %3305 = vmatmul.mubr.msk.f32.vlgmr.msra.gmra.mrb[10].mxu1 %vm1366_vm10, %v1539_v53 }
0x197b   :  { %v3566_v54 = vpop.eup %3565  ;;  %3313 = vmatpush3.xpose.msk.msra.mxu1 %vm1366_vm10, %v1714_v50  ;;  %3314 = vmatprep.mubr.msk.f32.mxu1 %vm3596_vm1, %v3597_v4 }
0x197c   :  { %v1541_v55 = vmul.f32 %v3566_v54, %v3562_v47  ;;  %3322 = vmatprep.subr.mxu1 %v3597_v4 }
0x197e   :  { %3310 = vmatmul.mubr.msk.f32.vlgmr.msra.gmra.mrb[14].mxu0 %vm1366_vm10, %v1541_v55  ;;  %3315 = vmatmul.mubr.msk.f32.vlgmr.msra.gmra.mrb[12].mxu1 %vm1366_vm10, %v1712_v57 }
0x197f   :  { %3318 = vmatpush3.xpose.msk.msra.mxu0 %vm1366_vm10, %v1792_v49  ;;  %3319 = vmatprep.mubr.msk.f32.mxu0 %vm3596_vm1, %v3597_v4 }
0x1980   :  { %3327 = vmatprep.subr.mxu0 %v3597_v4  ;;  %3324 = vmatprep.mubr.msk.f32.mxu1 %vm3596_vm1, %v3597_v4 }
0x1982   :  { %3320 = vmatmul.mubr.msk.f32.vlgmr.msra.gmra.mrb[16].mxu0 %vm1366_vm10, %v1790_v12 }
0x1983   :  { %3329 = vmatprep.mubr.msk.f32.mxu0 %vm3596_vm1, %v3597_v4 }
0x1a4d   :  { %v1614_v58 = vpop.f32.mrb[10].mxu1 }
0x1a4e   :  { %v1694_v59 = vsel %vm1366_vm10, %v1614_v58, 0.0  ;;  %v3306_v60 = vpop.f32.mrb[11].mxu1 }
0x1a4f   :  { %v1695_v15 = vrot.slane %v1694_v59, 4 }
0x1a51   :  { %v1696_v61 = vadd.f32 %v1695_v15, %v1694_v59  ;;  %v1690_v63 = vpop.f32.mrb[14].mxu0  ;;  %v1785_v17 = vpop.f32.mrb[12].mxu1 }
0x1a52   :  { %v1701_v1 = vsel %vm1366_vm10, %v1690_v63, 0.0  ;;  %v3311_v2 = vpop.f32.mrb[15].mxu0  ;;  %v3316_v3 = vpop.f32.mrb[13].mxu1  ;;  %v1867_v5 = vsel %vm1366_vm10, %v1785_v17, -inf }
0x1a53   :  { %v1697_v6 = vrot.slane %v1696_v61, 2  ;;  %v1702_v7 = vrot.slane %v1701_v1, 4  ;;  %1868 = vmax.xlane.f32.xlu1 %v1867_v5 }
0x1a55   :  { %v1698_v9 = vadd.f32 %v1697_v6, %v1696_v61  ;;  %v1703_v10 = vadd.f32 %v1702_v7, %v1701_v1  ;;  %v1863_v11 = vpop.f32.mrb[16].mxu0 }
0x1a56   :  { %v3321_v13 = vpop.f32.mrb[17].mxu0  ;;  %v1870_v14 = vsel %vm1366_vm10, %v1863_v11, -inf }
0x1a57   :  { %v1699_v16 = vrot.slane %v1698_v9, 1  ;;  %v1704_v18 = vrot.slane %v1703_v10, 2  ;;  %1871 = vmax.xlane.f32.xlu0 %v1870_v14 }
0x1a59   :  { %v1705_v19 = vadd.f32 %v1704_v18, %v1703_v10  ;;  %v1700_v20 = vadd.f32 %v1699_v16, %v1698_v9 }
0x1a5b   :  { %v1706_v21 = vrot.slane %v1705_v19, 1  ;;  %v1709_v23 = vmul.f32 0.125, %v1700_v20 }
0x1a5d   :  { %v1707_v22 = vadd.f32 %v1706_v21, %v1705_v19 }
0x1a5f   :  { %v1710_v56 = vmul.f32 0.125, %v1707_v22 }
0x1a61   :  { %v3937_v24 = vsel %vm2751_vm11, %v1710_v56, %v1709_v23 }
0x1a64   :  { %1965 = vrot.lane.b32.xlu1 %v3878_v62, %s3604_s30 }
0x1a68   :  { %2059 = vrot.lane.b32.xlu1 %v3880_v26, %s3605_s1 }
0x1a6d   :  { %1889 = vrot.lane.b32.xlu0 %v3880_v26, %s3604_s30 }
0x1a71   :  { %2137 = vrot.lane.b32.xlu0 %v3878_v62, %s3605_s1 }
0x1ae0   :  { %v1869_v25 = vpop.xlane.xlu1 %1868 }
0x1ae1   :  { %v1873_v27 = vsub.f32 %v1785_v17, %v1869_v25 }
0x1ae3   :  { %v1875_v29 = vmul.f32 1.442695, %v1873_v27 }
0x1ae4   :  { %v1966_v31 = vpop.permute.xlu1 %1965  ;;  %v1872_v32 = vpop.xlane.xlu0 %1871 }
0x1ae5   :  { %3567 = vpow2.f32 %v1875_v29  ;;  %v1874_v33 = vsub.f32 %v1863_v11, %v1872_v32  ;;  %3328 = vmatpush3.msra.mxu0 %v1966_v31 }
0x1ae6   :  { %3337 = vmatprep.subr.mxu0 %v3597_v4 }
0x1ae7   :  { %v1877_v34 = vmul.f32 1.442695, %v1874_v33 }
0x1ae8   :  { %v1890_v35 = vpop.permute.xlu0 %1889  ;;  %v2060_v41 = vpop.permute.xlu1 %2059 }
0x1ae9   :  { %3569 = vpow2.f32 %v1877_v34  ;;  %3323 = vmatpush3.msra.mxu1 %v1890_v35 }
0x1aea   :  { %3332 = vmatprep.subr.mxu1 %v3597_v4 }
0x1aec   :  { %v2138_v40 = vpop.permute.xlu0 %2137 }
0x1aef   :  { %v3568_v36 = vpop.eup %3567 }
0x1af0   :  { %v1879_v37 = vsel %vm1366_vm10, %v3568_v36, 0.0 }
0x1af1   :  { %1880 = vadd.xlane.f32.xlu0 %v1879_v37 }
0x1af3   :  { %v3570_v38 = vpop.eup %3569 }
0x1af4   :  { %v1882_v39 = vsel %vm1366_vm10, %v3570_v38, 0.0 }
0x1af5   :  { %1883 = vadd.xlane.f32.xlu1 %v1882_v39 }
0x1b06   :  { %2057 = vrot.lane.b32.xlu1 %v3886_v28, %s3606_s13 }
0x1b07   :  { %2135 = vrot.lane.b32.xlu0 %v3895_v30, %s3606_s13 }
0x1b7e   :  { %v1881_v42 = vpop.xlane.xlu0 %1880 }
0x1b7f   :  { %3571 = vrcp.f32 %v1881_v42 }
0x1b82   :  { %v1884_v43 = vpop.xlane.xlu1 %1883  ;;  %v2136_v49 = vpop.permute.xlu0 %2135 }
0x1b83   :  { %3573 = vrcp.f32 %v1884_v43 }
0x1b86   :  { %v2058_v48 = vpop.permute.xlu1 %2057 }
0x1b89   :  { %v3572_v44 = vpop.eup %3571 }
0x1b8a   :  { %v1886_v45 = vmul.f32 %v3572_v44, %v3568_v36 }
0x1b8c   :  { %3325 = vmatmul.mubr.msk.f32.vlgmr.msra.gmra.mrb[14].mxu1 %vm1366_vm10, %v1886_v45 }
0x1b8d   :  { %v3574_v46 = vpop.eup %3573  ;;  %3333 = vmatpush3.xpose.msk.msra.mxu1 %vm1366_vm10, %v2060_v41  ;;  %3334 = vmatprep.mubr.msk.f32.mxu1 %vm3596_vm1, %v3597_v4 }
0x1b8e   :  { %v1888_v47 = vmul.f32 %v3574_v46, %v3570_v38  ;;  %3342 = vmatprep.subr.mxu1 %v3597_v4 }
0x1b90   :  { %3330 = vmatmul.mubr.msk.f32.vlgmr.msra.gmra.mrb[18].mxu0 %vm1366_vm10, %v1888_v47  ;;  %3335 = vmatmul.mubr.msk.f32.vlgmr.msra.gmra.mrb[16].mxu1 %vm1366_vm10, %v2058_v48 }
0x1b91   :  { %3338 = vmatpush3.xpose.msk.msra.mxu0 %vm1366_vm10, %v2138_v40  ;;  %3339 = vmatprep.mubr.msk.f32.mxu0 %vm3596_vm1, %v3597_v4 }
0x1b92   :  { %3347 = vmatprep.subr.mxu0 %v3597_v4  ;;  %3344 = vmatprep.mubr.msk.f32.mxu1 %vm3596_vm1, %v3597_v4 }
0x1b94   :  { %3340 = vmatmul.mubr.msk.f32.vlgmr.msra.gmra.mrb[20].mxu0 %vm1366_vm10, %v2136_v49 }
0x1b95   :  { %3349 = vmatprep.mubr.msk.f32.mxu0 %vm3596_vm1, %v3597_v4 }
0x1c5f   :  { %v1961_v50 = vpop.f32.mrb[14].mxu1 }
0x1c60   :  { %v2041_v51 = vsel %vm1366_vm10, %v1961_v50, 0.0  ;;  %v3326_v52 = vpop.f32.mrb[15].mxu1 }
0x1c61   :  { %v2042_v8 = vrot.slane %v2041_v51, 4 }
0x1c63   :  { %v2043_v53 = vadd.f32 %v2042_v8, %v2041_v51  ;;  %v2037_v54 = vpop.f32.mrb[18].mxu0  ;;  %v2131_v55 = vpop.f32.mrb[16].mxu1 }
0x1c64   :  { %v2048_v57 = vsel %vm1366_vm10, %v2037_v54, 0.0  ;;  %v3331_v12 = vpop.f32.mrb[19].mxu0  ;;  %v3336_v58 = vpop.f32.mrb[17].mxu1  ;;  %v2213_v59 = vsel %vm1366_vm10, %v2131_v55, -inf }
0x1c65   :  { %v2044_v60 = vrot.slane %v2043_v53, 2  ;;  %v2049_v15 = vrot.slane %v2048_v57, 4  ;;  %2214 = vmax.xlane.f32.xlu1 %v2213_v59 }
0x1c67   :  { %v2045_v61 = vadd.f32 %v2044_v60, %v2043_v53  ;;  %v2050_v63 = vadd.f32 %v2049_v15, %v2048_v57  ;;  %v2209_v17 = vpop.f32.mrb[20].mxu0 }
0x1c68   :  { %v3341_v1 = vpop.f32.mrb[21].mxu0  ;;  %v2216_v2 = vsel %vm1366_vm10, %v2209_v17, -inf }
0x1c69   :  { %v2046_v3 = vrot.slane %v2045_v61, 1  ;;  %v2051_v5 = vrot.slane %v2050_v63, 2  ;;  %2217 = vmax.xlane.f32.xlu0 %v2216_v2 }
0x1c6b   :  { %v2052_v6 = vadd.f32 %v2051_v5, %v2050_v63  ;;  %v2047_v7 = vadd.f32 %v2046_v3, %v2045_v61 }
0x1c6d   :  { %v2053_v9 = vrot.slane %v2052_v6, 1  ;;  %v2055_v11 = vmul.f32 0.125, %v2047_v7 }
0x1c6f   :  { %v2054_v10 = vadd.f32 %v2053_v9, %v2052_v6 }
0x1c71   :  { %v2056_v13 = vmul.f32 0.125, %v2054_v10 }
0x1c73   :  { %v3970_v14 = vsel %vm2751_vm11, %v2056_v13, %v2055_v11 }
0x1c76   :  { %2311 = vrot.lane.b32.xlu1 %v3878_v62, %s3607_s14 }
0x1c7a   :  { %2405 = vrot.lane.b32.xlu1 %v3880_v26, %s3608_s15 }
0x1c7f   :  { %2235 = vrot.lane.b32.xlu0 %v3880_v26, %s3607_s14 }
0x1c83   :  { %2483 = vrot.lane.b32.xlu0 %v3878_v62, %s3608_s15 }
0x1cf2   :  { %v2215_v16 = vpop.xlane.xlu1 %2214 }
0x1cf3   :  { %v2219_v18 = vsub.f32 %v2131_v55, %v2215_v16 }
0x1cf5   :  { %v2221_v19 = vmul.f32 1.442695, %v2219_v18 }
0x1cf6   :  { %v2312_v20 = vpop.permute.xlu1 %2311  ;;  %v2218_v21 = vpop.xlane.xlu0 %2217 }
0x1cf7   :  { %3575 = vpow2.f32 %v2221_v19  ;;  %v2220_v22 = vsub.f32 %v2209_v17, %v2218_v21  ;;  %3348 = vmatpush3.msra.mxu0 %v2312_v20 }
0x1cf8   :  { %3357 = vmatprep.subr.mxu0 %v3597_v4 }
0x1cf9   :  { %v2223_v23 = vmul.f32 1.442695, %v2220_v22 }
0x1cfa   :  { %v2236_v56 = vpop.permute.xlu0 %2235  ;;  %v2406_v33 = vpop.permute.xlu1 %2405 }
0x1cfb   :  { %3577 = vpow2.f32 %v2223_v23  ;;  %3343 = vmatpush3.msra.mxu1 %v2236_v56  ;;  %v2776_v23 = vld [vmem:[%s4078_s6] sm:$0xff]  ;;  %v2777_v56 = vld [vmem:[%s4078_s6 + $0x8] sm:$0xff] }
0x1cfc   :  { %3352 = vmatprep.subr.mxu1 %v3597_v4 }
0x1cfe   :  { %v2484_v32 = vpop.permute.xlu0 %2483 }
0x1d01   :  { %v3576_v25 = vpop.eup %3575 }
0x1d02   :  { %v2225_v27 = vsel %vm1366_vm10, %v3576_v25, 0.0 }
0x1d03   :  { %2226 = vadd.xlane.f32.xlu0 %v2225_v27  ;;  %v3462_v27 = vpack.c.bf16 %v2777_v56, %v2776_v23 }
0x1d05   :  { %v3578_v29 = vpop.eup %3577 }
0x1d06   :  { %v2228_v31 = vsel %vm1366_vm10, %v3578_v29, 0.0 }
0x1d07   :  { %2229 = vadd.xlane.f32.xlu1 %v2228_v31 }
0x1d18   :  { %2403 = vrot.lane.b32.xlu1 %v3886_v28, %s3609_s16 }
0x1d19   :  { %2481 = vrot.lane.b32.xlu0 %v3895_v30, %s3609_s16 }
0x1d90   :  { %v2227_v34 = vpop.xlane.xlu0 %2226 }
0x1d91   :  { %3579 = vrcp.f32 %v2227_v34 }
0x1d94   :  { %v2230_v35 = vpop.xlane.xlu1 %2229  ;;  %v2482_v30 = vpop.permute.xlu0 %2481 }
0x1d95   :  { %3581 = vrcp.f32 %v2230_v35 }
0x1d98   :  { %v2404_v28 = vpop.permute.xlu1 %2403 }
0x1d9b   :  { %v3580_v36 = vpop.eup %3579 }
0x1d9c   :  { %v2232_v37 = vmul.f32 %v3580_v36, %v3576_v25  ;;  %v2778_v25 = vld [vmem:[%s4078_s6 + $0x10] sm:$0xff] }
0x1d9e   :  { %3345 = vmatmul.mubr.msk.f32.vlgmr.msra.gmra.mrb[18].mxu1 %vm1366_vm10, %v2232_v37 }
0x1d9f   :  { %v3582_v38 = vpop.eup %3581  ;;  %3353 = vmatpush3.xpose.msk.msra.mxu1 %vm1366_vm10, %v2406_v33  ;;  %3354 = vmatprep.mubr.msk.f32.mxu1 %vm3596_vm1, %v3597_v4 }
0x1da0   :  { %v2234_v39 = vmul.f32 %v3582_v38, %v3578_v29  ;;  %3362 = vmatprep.subr.mxu1 %v3597_v4  ;;  %v2779_v29 = vld [vmem:[%s4078_s6 + $0x18] sm:$0xff] }
0x1da1   :  { %v3465_v31 = vpack.c.bf16 %v2779_v29, %v2778_v25 }
0x1da2   :  { %3350 = vmatmul.mubr.msk.f32.vlgmr.msra.gmra.mrb[22].mxu0 %vm1366_vm10, %v2234_v39  ;;  %3355 = vmatmul.mubr.msk.f32.vlgmr.msra.gmra.mrb[20].mxu1 %vm1366_vm10, %v2404_v28 }
0x1da3   :  { %3358 = vmatpush3.xpose.msk.msra.mxu0 %vm1366_vm10, %v2484_v32  ;;  %3359 = vmatprep.mubr.msk.f32.mxu0 %vm3596_vm1, %v3597_v4 }
0x1da4   :  { %3367 = vmatprep.subr.mxu0 %v3597_v4  ;;  %3364 = vmatprep.mubr.msk.f32.mxu1 %vm3596_vm1, %v3597_v4 }
0x1da6   :  { %3360 = vmatmul.mubr.msk.f32.vlgmr.msra.gmra.mrb[24].mxu0 %vm1366_vm10, %v2482_v30 }
0x1da7   :  { %3369 = vmatprep.mubr.msk.f32.mxu0 %vm3596_vm1, %v3597_v4 }
0x1e71   :  { %v2307_v40 = vpop.f32.mrb[18].mxu1 }
0x1e72   :  { %v2387_v41 = vsel %vm1366_vm10, %v2307_v40, 0.0  ;;  %v3346_v42 = vpop.f32.mrb[19].mxu1 }
0x1e73   :  { %v2388_v43 = vrot.slane %v2387_v41, 4 }
0x1e75   :  { %v2389_v44 = vadd.f32 %v2388_v43, %v2387_v41  ;;  %v2383_v45 = vpop.f32.mrb[22].mxu0  ;;  %v2477_v46 = vpop.f32.mrb[20].mxu1 }
0x1e76   :  { %v2394_v47 = vsel %vm1366_vm10, %v2383_v45, 0.0  ;;  %v3351_v48 = vpop.f32.mrb[23].mxu0  ;;  %v3356_v49 = vpop.f32.mrb[21].mxu1  ;;  %v2559_v50 = vsel %vm1366_vm10, %v2477_v46, -inf  ;;  %v2861_v45 = vld [vmem:[%s4079_s8 + $0x8] sm:$0xff] }
0x1e77   :  { %v2390_v51 = vrot.slane %v2389_v44, 2  ;;  %v2395_v52 = vrot.slane %v2394_v47, 4  ;;  %2560 = vmax.xlane.f32.xlu1 %v2559_v50 }
0x1e79   :  { %v2391_v8 = vadd.f32 %v2390_v51, %v2389_v44  ;;  %v2396_v53 = vadd.f32 %v2395_v52, %v2394_v47  ;;  %v2555_v54 = vpop.f32.mrb[24].mxu0  ;;  %v2860_v44 = vld [vmem:[%s4079_s8] sm:$0xff] }
0x1e7a   :  { %v3361_v55 = vpop.f32.mrb[25].mxu0  ;;  %v2562_v57 = vsel %vm1366_vm10, %v2555_v54, -inf }
0x1e7b   :  { %v2392_v12 = vrot.slane %v2391_v8, 1  ;;  %v2397_v58 = vrot.slane %v2396_v53, 2  ;;  %2563 = vmax.xlane.f32.xlu0 %v2562_v57 }
0x1e7d   :  { %v2398_v59 = vadd.f32 %v2397_v58, %v2396_v53  ;;  %v2393_v60 = vadd.f32 %v2392_v12, %v2391_v8 }
0x1e7f   :  { %v2399_v15 = vrot.slane %v2398_v59, 1  ;;  %v2401_v63 = vmul.f32 0.125, %v2393_v60  ;;  %v3084_v60 = vld [vmem:[%s4080_s7] ss:$0 sm:$0xff] }
0x1e81   :  { %v2400_v61 = vadd.f32 %v2399_v15, %v2398_v59  ;;  %v2863_v59 = vld [vmem:[%s4079_s8 + $0x18] sm:$0xff] }
0x1e83   :  { %v2402_v17 = vmul.f32 0.125, %v2400_v61 }
0x1e85   :  { %v2762_v1 = vsel %vm2751_vm11, %v2402_v17, %v2401_v63  ;;  %v2946_v17 = vld [vmem:[%s4081_s10 + $0x8] sm:$0xff] }
0x1f04   :  { %v2561_v2 = vpop.xlane.xlu1 %2560 }
0x1f05   :  { %v2565_v3 = vsub.f32 %v2477_v46, %v2561_v2  ;;  %v3468_v46 = vpack.c.bf16 %v2861_v45, %v2860_v44  ;;  %v17_v2 = vstv %s4082_s11 }
0x1f06   :  { %18 = vst [vmem:[#allocation2] sm:$0x1] %v17_v2 }
0x1f07   :  { %v2567_v5 = vmul.f32 1.442695, %v2565_v3  ;;  %v3086_v3 = vld [vmem:[%s4083_s9] ss:$0 sm:$0xff] }
0x1f08   :  { %v2564_v6 = vpop.xlane.xlu0 %2563 }
0x1f09   :  { %3583 = vpow2.f32 %v2567_v5  ;;  %v2566_v7 = vsub.f32 %v2555_v54, %v2564_v6 }
0x1f0b   :  { %v2569_v9 = vmul.f32 1.442695, %v2566_v7 }
0x1f0d   :  { %3585 = vpow2.f32 %v2569_v9 }
0x1f13   :  { %v3584_v10 = vpop.eup %3583 }
0x1f14   :  { %v2571_v11 = vsel %vm1366_vm10, %v3584_v10, 0.0 }
0x1f15   :  { %2572 = vadd.xlane.f32.xlu0 %v2571_v11 }
0x1f17   :  { %v3586_v13 = vpop.eup %3585 }
0x1f18   :  { %v2574_v16 = vsel %vm1366_vm10, %v3586_v13, 0.0 }
0x1f19   :  { %2575 = vadd.xlane.f32.xlu1 %v2574_v16 }
0x1f2a   :  { %2657 = vrot.lane.b32.xlu1 %v3878_v62, %s3610_s17 }
0x1f2b   :  { %2581 = vrot.lane.b32.xlu0 %v3880_v26, %s3610_s17 }
0x1f2e   :  { %2757 = vrot.lane.b32.xlu1 %v3970_v14, %s3611_s0 }
0x1f2f   :  { %2763 = vrot.lane.b32.xlu0 %v2762_v1, %s3612_s2 }
0x1fa2   :  { %v2573_v18 = vpop.xlane.xlu0 %2572 }
0x1fa3   :  { %3587 = vrcp.f32 %v2573_v18 }
0x1fa6   :  { %v2576_v19 = vpop.xlane.xlu1 %2575  ;;  %v2582_v20 = vpop.permute.xlu0 %2581 }
0x1fa7   :  { %3589 = vrcp.f32 %v2576_v19  ;;  %3363 = vmatpush3.msra.mxu1 %v2582_v20 }
0x1fa8   :  { %3461 = vmatprep.subr.bf16.mxu1 %v3595_v0 }
0x1faa   :  { %v2658_v21 = vpop.permute.xlu1 %2657  ;;  %v2764_v55 = vpop.permute.xlu0 %2763 }
0x1fab   :  { %3368 = vmatpush3.msra.mxu0 %v2658_v21 }
0x1fac   :  { %3467 = vmatprep.subr.bf16.mxu0 %v3595_v0 }
0x1fad   :  { %v3588_v62 = vpop.eup %3587 }
0x1fae   :  { %v2578_v22 = vmul.f32 %v3588_v62, %v3584_v10  ;;  %v2758_v53 = vpop.permute.xlu1 %2757  ;;  %v3088_v10 = vld [vmem:[#allocation2] ss:$0 sm:$0xff] }
0x1faf   :  { %v2772_v54 = vsel %vm1366_vm10, %v3937_v24, %v2758_v53 }
0x1fb0   :  { %3365 = vmatmul.mubr.msk.f32.vlgmr.msra.gmra.mrb[22].mxu1 %vm1366_vm10, %v2578_v22  ;;  %v2773_v57 = vsel %vm54_vm0, %v2772_v54, %v2764_v55 }
0x1fb1   :  { %v3590_v26 = vpop.eup %3589  ;;  %3380 = vmatprep.mubr.msk.f32.mxu1 %vm3596_vm1, %v3597_v4  ;;  %3463 = vmatpush3.bf16.msra.mxu1 %v3462_v27 }
0x1fb2   :  { %v2580_v14 = vmul.f32 %v3590_v26, %v3586_v13  ;;  %3464 = vmatprep.subr.bf16.mxu1 %v3595_v0 }
0x1fb4   :  { %3370 = vmatmul.mubr.msk.f32.vlgmr.msra.gmra.mrb[26].mxu0 %vm1366_vm10, %v2580_v14 }
0x1fb5   :  { %3391 = vmatprep.mubr.msk.f32.mxu0 %vm3596_vm1, %v3597_v4  ;;  %3466 = vmatpush3.bf16.msra.mxu1 %v3465_v31 }
0x1fb6   :  { %3473 = vmatprep.subr.bf16.mxu1 %v3595_v0  ;;  %3469 = vmatpush3.bf16.msra.mxu0 %v3468_v46 }
0x1fb7   :  { %3470 = vmatprep.subr.bf16.mxu0 %v3595_v0  ;;  %v2862_v0 = vld [vmem:[%s4079_s8 + $0x10] sm:$0xff] }
0x1fb8   :  { %v3471_v24 = vpack.c.bf16 %v2863_v59, %v2862_v0 }
0x1fba   :  { %3472 = vmatpush3.bf16.msra.mxu0 %v3471_v24 }
0x2083   :  { %v2653_v32 = vpop.f32.mrb[22].mxu1 }
0x2084   :  { %v2733_v33 = vsel %vm1366_vm10, %v2653_v32, 0.0  ;;  %v3366_v34 = vpop.f32.mrb[23].mxu1 }
0x2085   :  { %v2734_v35 = vrot.slane %v2733_v33, 4 }
0x2087   :  { %v2735_v36 = vadd.f32 %v2734_v35, %v2733_v33  ;;  %v2729_v37 = vpop.f32.mrb[26].mxu0 }
0x2088   :  { %v2740_v38 = vsel %vm1366_vm10, %v2729_v37, 0.0  ;;  %v3371_v39 = vpop.f32.mrb[27].mxu0 }
0x2089   :  { %v2736_v28 = vrot.slane %v2735_v36, 2  ;;  %v2741_v30 = vrot.slane %v2740_v38, 4 }
0x208b   :  { %v2737_v40 = vadd.f32 %v2736_v28, %v2735_v36  ;;  %v2742_v41 = vadd.f32 %v2741_v30, %v2740_v38 }
0x208d   :  { %v2738_v42 = vrot.slane %v2737_v40, 1  ;;  %v2743_v43 = vrot.slane %v2742_v41, 2 }
0x208f   :  { %v2744_v47 = vadd.f32 %v2743_v43, %v2742_v41  ;;  %v2739_v48 = vadd.f32 %v2738_v42, %v2737_v40 }
0x2091   :  { %v2745_v49 = vrot.slane %v2744_v47, 1  ;;  %v2747_v51 = vmul.f32 0.125, %v2739_v48 }
0x2093   :  { %v2746_v50 = vadd.f32 %v2745_v49, %v2744_v47 }
0x2095   :  { %v2748_v52 = vmul.f32 0.125, %v2746_v50 }
0x2097   :  { %v2768_v8 = vsel %vm2751_vm11, %v2748_v52, %v2747_v51 }
0x2098   :  { %2769 = vrot.lane.b32.xlu1 %v2768_v8, %s3613_s27 }
0x210a   :  { %v2770_v12 = vpop.permute.xlu1 %2769 }
0x210b   :  { %v2775_v58 = vsel %vm2774_vm12, %v2773_v57, %v2770_v12 }
0x210c   :  { %3381 = vmatmul.mubr.msk.f32.vlgmr.msra.gmra.mrb[24].mxu1 %vm140_vm2, %v2775_v58 }
0x210d   :  { %3398 = vmatprep.mubr.msk.f32.mxu1 %vm3596_vm1, %v3597_v4  ;;  %v2945_v4 = vld [vmem:[%s4081_s10] sm:$0xff] }
0x210e   :  { %v3474_v1 = vpack.c.bf16 %v2946_v17, %v2945_v4 }
0x2110   :  { %3475 = vmatpush3.bf16.msra.mxu1 %v3474_v1 }
0x21df   :  { %v2856_v15 = vpop.f32.mrb[24].mxu1 }
0x21e0   :  { %v2857_v61 = vadd.f32 %v3084_v60, %v2856_v15  ;;  %v3382_v63 = vpop.f32.mrb[25].mxu1 }
0x21e2   :  { %3392 = vmatmul.mubr.msk.f32.vlgmr.msra.gmra.mrb[28].mxu0 %vm140_vm2, %v2857_v61 }
0x22b5   :  { %v2940_v5 = vpop.f32.mrb[28].mxu0 }
0x22b6   :  { %v2941_v6 = vadd.f32 %v3086_v3, %v2940_v5  ;;  %v3393_v7 = vpop.f32.mrb[29].mxu0 }
0x22b8   :  { %v2944_v9 = vmax.f32 %v2941_v6, 0.0 }
0x22ba   :  { %3399 = vmatmul.mubr.msk.f32.vlgmr.msra.gmra.mrb[26].mxu1 %vm54_vm0, %v2944_v9 }
0x238d   :  { %v3023_v11 = vpop.f32.mrb[26].mxu1 }
0x238e   :  { %v3024_v13 = vadd.f32 %v3088_v10, %v3023_v11  ;;  %v3400_v16 = vpop.f32.mrb[27].mxu1 }
0x2390   :  { %v3090_v18 = vmul.f32 -1.442695, %v3024_v13 }
0x2392   :  { %3591 = vpow2.f32 %v3090_v18 }
0x239c   :  { %v3592_v19 = vpop.eup %3591 }
0x239d   :  { %v3030_v20 = vadd.f32 1.0, %v3592_v19 }
0x239f   :  { %3593 = vrcp.f32 %v3030_v20 }
0x23a9   :  { %v3594_v21 = vpop.eup %3593 }
0x23aa   :  { %3034 = vst.msk [vmem:[%s4084_s12] sm:$0x3] %vm3033_vm13, %v3594_v21 }

</bundles_post_ra>
